<compile_context>
chip_gen: v5e
topology: v5e:2x2
jax: 0.10.0
libtpu: 0.0.40
codegen_flags: <defaults>
</compile_context>

<pallas_src>
import functools
import math

import jax
import jax.numpy as jnp
from jax.experimental import pallas as pl
from jax.experimental.pallas import tpu as pltpu


# ----------------------------------------------------------------------------
# Encoder kernel: whole GRU recurrence in one kernel (grid=(1,), fori_loop over T).
# Input-gate matmul hoisted to a single big MXU pass before the loop; attention keys
# (enc_out @ W_attn_e) computed as an epilogue while enc_out is VMEM-resident.
# ----------------------------------------------------------------------------
def encoder_gru_kernel(x_ref, wih_ref, whh_ref, bih_ref, bhh_ref, wae_ref,
                       out_ref, eproj_ref, hfin_ref, gi_ref):
    T, B, HP = x_ref.shape

    # Hoisted input-side gate projection for ALL timesteps: one (T*B, HP)x(HP, 3HP) matmul.
    x_flat = x_ref[...].reshape(T * B, HP)                             # bf16, layout-free
    gi_ref[...] = (jnp.dot(x_flat, wih_ref[...],
                           preferred_element_type=jnp.float32)
                   + bih_ref[...]).reshape(T, B, 3 * HP)

    # Loop-invariant bias broadcast hoisted out of the serial chain.
    bhh = jnp.broadcast_to(bhh_ref[...], (B, 3 * HP))

    def step(t, h):
        gi = gi_ref[t]                                                 # (B, 3HP) f32
        gh = jnp.dot(h.astype(jnp.bfloat16), whh_ref[...],
                     preferred_element_type=jnp.float32) + bhh        # (B, 3HP)
        r = jax.nn.sigmoid(gi[:, :HP] + gh[:, :HP])
        z = jax.nn.sigmoid(gi[:, HP:2 * HP] + gh[:, HP:2 * HP])
        n = jnp.tanh(gi[:, 2 * HP:] + r * gh[:, 2 * HP:])
        h_new = (1.0 - z) * n + z * h
        out_ref[t] = h_new.astype(jnp.bfloat16)
        return h_new

    h_final = jax.lax.fori_loop(0, T, step, jnp.zeros((B, HP), jnp.float32))
    hfin_ref[...] = h_final                                            # written once

    # Epilogue: Bahdanau attention keys  eproj = enc_out @ W_attn_e  (enc_out still in VMEM).
    enc_flat = out_ref[...].reshape(T * B, HP)                         # bf16
    eproj_ref[...] = jnp.dot(enc_flat, wae_ref[...],
                             preferred_element_type=jnp.float32
                             ).astype(jnp.bfloat16).reshape(T, B, HP)


def run_encoder(src_emb, p):
    T, B, HP = src_emb.shape
    grid_spec = pltpu.PrefetchScalarGridSpec(
        num_scalar_prefetch=0,
        grid=(1,),
        in_specs=[
            pl.BlockSpec((T, B, HP), lambda i: (0, 0, 0)),     # embedded src (bf16)
            pl.BlockSpec((HP, 3 * HP), lambda i: (0, 0)),      # W_ih packed [r|z|n] (bf16)
            pl.BlockSpec((HP, 3 * HP), lambda i: (0, 0)),      # W_hh packed (bf16)
            pl.BlockSpec((1, 3 * HP), lambda i: (0, 0)),       # b_ih packed (f32)
            pl.BlockSpec((1, 3 * HP), lambda i: (0, 0)),       # b_hh packed (f32)
            pl.BlockSpec((HP, HP), lambda i: (0, 0)),          # W_attn_e (bf16)
        ],
        out_specs=[
            pl.BlockSpec((T, B, HP), lambda i: (0, 0, 0)),     # encoder_outputs (bf16)
            pl.BlockSpec((T, B, HP), lambda i: (0, 0, 0)),     # attention keys   (bf16)
            pl.BlockSpec((B, HP), lambda i: (0, 0)),           # final hidden     (f32)
        ],
        scratch_shapes=[pltpu.VMEM((T, B, 3 * HP), jnp.float32)],   # hoisted input gates
    )
    out_shapes = (
        jax.ShapeDtypeStruct((T, B, HP), jnp.bfloat16),
        jax.ShapeDtypeStruct((T, B, HP), jnp.bfloat16),
        jax.ShapeDtypeStruct((B, HP), jnp.float32),
    )
    return pl.pallas_call(
        encoder_gru_kernel,
        out_shape=out_shapes,
        grid_spec=grid_spec,
        compiler_params=pltpu.CompilerParams(dimension_semantics=("arbitrary",)),
    )(src_emb, p["w_ih_enc"], p["w_hh_enc"], p["b_ih_enc"], p["b_hh_enc"], p["w_attn_e"])


# ----------------------------------------------------------------------------
# Decoder kernel: whole attention-GRU recurrence in one kernel.
# Input-gate (emb) projection hoisted before the loop; per step only one fused
# h @ [W_attn_h | W_hh] matmul and one ctx @ W_ih_c matmul remain.
# ----------------------------------------------------------------------------
def attn_decoder_kernel(temb_ref, h0_ref, enc_ref, eproj_ref,
                        wh4_ref, bh4_ref, va_ref,
                        wie_ref, wic_ref, bih_ref,
                        hout_ref, cout_ref, gi_ref):
    T = temb_ref.shape[0]
    S = enc_ref.shape[0]
    B, HP = h0_ref.shape

    # Hoisted input-side gate projection for ALL target steps.
    emb_flat = temb_ref[...].reshape(T * B, HP)                        # bf16
    gi_ref[...] = (jnp.dot(emb_flat, wie_ref[...],
                           preferred_element_type=jnp.float32)
                   + bih_ref[...]).reshape(T, B, 3 * HP)

    # Loop-invariant reads / broadcasts hoisted out of the serial chain.
    v_attn = va_ref[...].reshape(1, 1, HP)                             # (1,1,HP) f32
    bh4 = jnp.broadcast_to(bh4_ref[...], (B, 4 * HP))                  # fused [b_attn|b_hh]

    def step(t, h):
        h_bf = h.astype(jnp.bfloat16)

        # Single fused matmul for both h consumers: [W_attn_h | W_hh] packed (HP, 4HP).
        hp4 = jnp.dot(h_bf, wh4_ref[...], preferred_element_type=jnp.float32) + bh4
        h_proj = hp4[:, :HP]                                           # (B, HP)
        gh = hp4[:, HP:]                                               # (B, 3HP)

        # --- Bahdanau additive attention over the src axis (f32 elementwise math) ---
        energy = jnp.tanh(eproj_ref[...].astype(jnp.float32) + h_proj[None, :, :])  # (S,B,HP)
        scores = jnp.sum(energy * v_attn, axis=-1, keepdims=True)                   # (S,B,1)
        s_max = jnp.max(scores, axis=0, keepdims=True)
        ex = jnp.exp(scores - s_max)
        denom = jnp.sum(ex, axis=0, keepdims=True)
        attn = ex * pl.reciprocal(denom, approx=True)                               # (S,B,1)
        ctx = jnp.sum(attn * enc_ref[...].astype(jnp.float32), axis=0)              # (B,HP) f32

        # --- GRU cell on [emb ; ctx]; emb half precomputed, ctx half in-loop ---
        gi = gi_ref[t] + jnp.dot(ctx.astype(jnp.bfloat16), wic_ref[...],
                                 preferred_element_type=jnp.float32)                # (B, 3HP)
        r = jax.nn.sigmoid(gi[:, :HP] + gh[:, :HP])
        z = jax.nn.sigmoid(gi[:, HP:2 * HP] + gh[:, HP:2 * HP])
        n = jnp.tanh(gi[:, 2 * HP:] + r * gh[:, 2 * HP:])
        h_new = (1.0 - z) * n + z * h

        hout_ref[t] = h_new.astype(jnp.bfloat16)
        cout_ref[t] = ctx.astype(jnp.bfloat16)
        return h_new

    jax.lax.fori_loop(0, T, step, h0_ref[...])


def run_decoder(trg_emb, h0, enc_out, eproj, p):
    Ttrg, B, HP = trg_emb.shape
    S = enc_out.shape[0]
    grid_spec = pltpu.PrefetchScalarGridSpec(
        num_scalar_prefetch=0,
        grid=(1,),
        in_specs=[
            pl.BlockSpec((Ttrg, B, HP), lambda i: (0, 0, 0)),  # embedded trg (bf16)
            pl.BlockSpec((B, HP), lambda i: (0, 0)),           # encoder final hidden (f32)
            pl.BlockSpec((S, B, HP), lambda i: (0, 0, 0)),     # encoder outputs (bf16)
            pl.BlockSpec((S, B, HP), lambda i: (0, 0, 0)),     # attention keys   (bf16)
            pl.BlockSpec((HP, 4 * HP), lambda i: (0, 0)),      # [W_attn_h | W_hh] (bf16)
            pl.BlockSpec((1, 4 * HP), lambda i: (0, 0)),       # [b_attn | b_hh]   (f32)
            pl.BlockSpec((1, HP), lambda i: (0, 0)),           # v_attn
            pl.BlockSpec((HP, 3 * HP), lambda i: (0, 0)),      # W_ih (emb half, packed, bf16)
            pl.BlockSpec((HP, 3 * HP), lambda i: (0, 0)),      # W_ih (ctx half, packed, bf16)
            pl.BlockSpec((1, 3 * HP), lambda i: (0, 0)),       # b_ih packed
        ],
        out_specs=[
            pl.BlockSpec((Ttrg, B, HP), lambda i: (0, 0, 0)),  # h_new per step (bf16)
            pl.BlockSpec((Ttrg, B, HP), lambda i: (0, 0, 0)),  # ctx per step   (bf16)
        ],
        scratch_shapes=[pltpu.VMEM((Ttrg, B, 3 * HP), jnp.float32)],   # hoisted input gates
    )
    out_shapes = (
        jax.ShapeDtypeStruct((Ttrg, B, HP), jnp.bfloat16),
        jax.ShapeDtypeStruct((Ttrg, B, HP), jnp.bfloat16),
    )
    return pl.pallas_call(
        attn_decoder_kernel,
        out_shape=out_shapes,
        grid_spec=grid_spec,
        compiler_params=pltpu.CompilerParams(dimension_semantics=("arbitrary",)),
    )(trg_emb, h0, enc_out, eproj,
      p["w_h4_dec"], p["b_h4_dec"], p["v_attn"],
      p["w_ih_dec_e"], p["w_ih_dec_c"], p["b_ih_dec"])


# ----------------------------------------------------------------------------
# Vocab projection + log_softmax, hoisted out of the sequential loop and tiled over
# batch tiles (parallel grid -> pipelined, shardable across v7x's two TensorCores).
# Writes the output directly in (B, T, vocab) layout; padded vocab columns carry a
# -1e9 bias (so softmax over the padded width matches the unpadded model) and are
# cropped by the out BlockSpec instead of a wrapper pass over the V-wide logits.
# TODO(synk): for very large V the vocab axis should also be tiled with a two-pass LSE.
# ----------------------------------------------------------------------------
def vocab_proj_kernel(h_ref, c_ref, woh_ref, woc_ref, bo_ref, out_ref):
    Bt, T, HP = h_ref.shape
    V = out_ref.shape[-1]
    VP = woh_ref.shape[-1]
    h2 = h_ref[...].reshape(Bt * T, HP)                                # bf16
    c2 = c_ref[...].reshape(Bt * T, HP)                                # bf16
    logits = (jnp.dot(h2, woh_ref[...], preferred_element_type=jnp.float32)
              + jnp.dot(c2, woc_ref[...], preferred_element_type=jnp.float32)
              + bo_ref[...])                                           # (Bt*T, VP)
    m = jnp.max(logits, axis=-1, keepdims=True)
    lse = jnp.log(jnp.sum(jnp.exp(logits - m), axis=-1, keepdims=True)) + m
    logp = (logits - lse).reshape(Bt, T, VP)
    out_ref[...] = logp[:, :, :V]                                      # crop padded cols


def run_vocab_projection(h_bt, ctx_bt, p, vocab):
    B, T, HP = h_bt.shape
    VP = p["w_out_h"].shape[1]
    bt = 4 if (B % 4 == 0 and B > 4) else B                            # batch tile
    grid_spec = pltpu.PrefetchScalarGridSpec(
        num_scalar_prefetch=0,
        grid=(B // bt,),
        in_specs=[
            pl.BlockSpec((bt, T, HP), lambda b: (b, 0, 0)),    # decoder hiddens (bf16)
            pl.BlockSpec((bt, T, HP), lambda b: (b, 0, 0)),    # contexts        (bf16)
            pl.BlockSpec((HP, VP), lambda b: (0, 0)),          # W_out (hidden half, bf16)
            pl.BlockSpec((HP, VP), lambda b: (0, 0)),          # W_out (ctx half, bf16)
            pl.BlockSpec((1, VP), lambda b: (0, 0)),           # b_out (-1e9 in padded cols)
        ],
        out_specs=pl.BlockSpec((bt, T, vocab), lambda b: (b, 0, 0)),
    )
    return pl.pallas_call(
        vocab_proj_kernel,
        out_shape=jax.ShapeDtypeStruct((B, T, vocab), jnp.float32),
        grid_spec=grid_spec,
        compiler_params=pltpu.CompilerParams(dimension_semantics=("parallel",)),
    )(h_bt, ctx_bt, p["w_out_h"], p["w_out_c"], p["b_out"])


# ----------------------------------------------------------------------------
# Full Seq2Seq forward (embedding gathers + one narrow (H-wide) layout swap are XLA glue).
# ----------------------------------------------------------------------------
@functools.partial(jax.jit, static_argnames=("vocab",))
def seq2seq_forward(params, src, trg, *, vocab):
    # src, trg: (T, B) int32; returns (B, T, vocab) float32 log-probabilities.
    p = params
    src_emb = jnp.take(p["emb_enc"], src, axis=0).astype(jnp.bfloat16)   # (T, B, HP)
    enc_out, eproj, h_enc = run_encoder(src_emb, p)

    trg_emb = jnp.take(p["emb_dec"], trg, axis=0).astype(jnp.bfloat16)   # (T, B, HP)
    h_all, ctx_all = run_decoder(trg_emb, h_enc, enc_out, eproj, p)

    # Cheap (T,B,HP)->(B,T,HP) swap on the narrow bf16 activations so the wide V-dim
    # log-prob tensor is produced by the projection kernel directly in its final layout.
    h_bt = jnp.swapaxes(h_all, 0, 1)
    ctx_bt = jnp.swapaxes(ctx_all, 0, 1)
    return run_vocab_projection(h_bt, ctx_bt, p, vocab)                  # (B, T, V)


# ----------------------------------------------------------------------------
# Parameter construction: real-size (H, V) model params, then padded to lane-dense
# multiples of 128 (HP, VP); matmul weights cast to bf16, biases kept in f32.
# ----------------------------------------------------------------------------
def _round_up(x, m):
    return ((x + m - 1) // m) * m


def init_params(key, vocab_size, hidden):
    H, V = hidden, vocab_size
    k = 1.0 / math.sqrt(H)
    keys = jax.random.split(key, 18)

    def u(kk, shape, scale=k):
        return jax.random.uniform(kk, shape, jnp.float32, -scale, scale)

    return dict(
        # encoder
        emb_enc=u(keys[0], (V, H), 1.0),
        w_ih_enc=u(keys[1], (H, 3 * H)),      # packed gates [r|z|n], x @ W layout
        w_hh_enc=u(keys[2], (H, 3 * H)),
        b_ih_enc=u(keys[3], (1, 3 * H)),
        b_hh_enc=u(keys[4], (1, 3 * H)),
        # decoder
        emb_dec=u(keys[5], (V, H), 1.0),
        w_attn_h=u(keys[6], (H, H)),
        w_attn_e=u(keys[7], (H, H)),
        b_attn=u(keys[8], (1, H)),
        v_attn=u(keys[9], (1, H)),
        w_ih_dec_e=u(keys[10], (H, 3 * H)),
        w_ih_dec_c=u(keys[11], (H, 3 * H)),
        w_hh_dec=u(keys[12], (H, 3 * H)),
        b_ih_dec=u(keys[13], (1, 3 * H)),
        b_hh_dec=u(keys[14], (1, 3 * H)),
        w_out_h=u(keys[15], (H, V)),
        w_out_c=u(keys[16], (H, V)),
        b_out=u(keys[17], (1, V)),
    )


def pad_params(p, hidden, vocab):
    H, V = hidden, vocab
    HP = _round_up(H, 128)
    VP = _round_up(V, 128)
    bf = jnp.bfloat16

    def pad2(x, rows, cols, fill=0.0):
        r, c = x.shape
        return jnp.pad(x, ((0, rows - r), (0, cols - c)), constant_values=fill)

    def pad_gates(w, rows_out):
        # (rows, 3H) -> (rows_out, 3*HP); each gate padded independently so the
        # kernel slices gates at lane-aligned [k*HP : (k+1)*HP] offsets.
        parts = [pad2(w[:, i * H:(i + 1) * H], rows_out, HP) for i in range(3)]
        return jnp.concatenate(parts, axis=1)

    w_attn_h_p = pad2(p["w_attn_h"], HP, HP)
    w_hh_dec_p = pad_gates(p["w_hh_dec"], HP)
    b_attn_p = pad2(p["b_attn"], 1, HP)
    b_hh_dec_p = pad_gates(p["b_hh_dec"], 1)

    return dict(
        emb_enc=pad2(p["emb_enc"], V, HP),
        w_ih_enc=pad_gates(p["w_ih_enc"], HP).astype(bf),
        w_hh_enc=pad_gates(p["w_hh_enc"], HP).astype(bf),
        b_ih_enc=pad_gates(p["b_ih_enc"], 1),
        b_hh_enc=pad_gates(p["b_hh_enc"], 1),
        emb_dec=pad2(p["emb_dec"], V, HP),
        w_attn_e=pad2(p["w_attn_e"], HP, HP).astype(bf),
        v_attn=pad2(p["v_attn"], 1, HP),
        # fused per-step h projection: [W_attn_h | W_hh_dec] and [b_attn | b_hh_dec]
        w_h4_dec=jnp.concatenate([w_attn_h_p, w_hh_dec_p], axis=1).astype(bf),
        b_h4_dec=jnp.concatenate([b_attn_p, b_hh_dec_p], axis=1),
        w_ih_dec_e=pad_gates(p["w_ih_dec_e"], HP).astype(bf),
        w_ih_dec_c=pad_gates(p["w_ih_dec_c"], HP).astype(bf),
        b_ih_dec=pad_gates(p["b_ih_dec"], 1),
        w_out_h=pad2(p["w_out_h"], HP, VP).astype(bf),
        w_out_c=pad2(p["w_out_c"], HP, VP).astype(bf),
        b_out=pad2(p["b_out"], 1, VP, fill=-1e9),   # mask padded vocab cols out of softmax
    )


if __name__ == "__main__":
    VOCAB = 16
    HIDDEN = 32
    # NOTE: the reference forward() reads trg_len/batch from src.shape[0]/[1]
    # in swapped order; using T == B makes both readings consistent.
    # T and B are multiples of 8 so in-kernel leading-dim reshapes are layout-free.
    T = 8
    B = 8

    key = jax.random.PRNGKey(0)
    kp, ks, kt = jax.random.split(key, 3)
    params = init_params(kp, VOCAB, HIDDEN)
    padded = pad_params(params, HIDDEN, VOCAB)
    src = jax.random.randint(ks, (T, B), 0, VOCAB, dtype=jnp.int32)
    trg = jax.random.randint(kt, (T, B), 0, VOCAB, dtype=jnp.int32)

    out = seq2seq_forward(padded, src, trg, vocab=VOCAB)
    out = jax.block_until_ready(out)
    assert out.shape == (B, T, VOCAB), out.shape
    assert bool(jnp.all(jnp.isfinite(out)))
    # log-probabilities over the *real* vocab must normalize (padded cols masked out).
    assert bool(jnp.allclose(jnp.sum(jnp.exp(out), axis=-1), 1.0, atol=1e-3))
    print("KERNEL_OK")
</pallas_src>

<mosaic_0001>
module attributes {stable_mosaic.version = 11 : i64} {
  func.func @vocab_proj_kernel(%arg0: i32, %arg1: memref<4x8x128xbf16, #tpu.memory_space<vmem>>, %arg2: memref<4x8x128xbf16, #tpu.memory_space<vmem>>, %arg3: memref<128x128xbf16, #tpu.memory_space<vmem>>, %arg4: memref<128x128xbf16, #tpu.memory_space<vmem>>, %arg5: memref<1x128xf32, #tpu.memory_space<vmem>>, %arg6: memref<4x8x16xf32, #tpu.memory_space<vmem>>) attributes {dimension_semantics = [#tpu.dimension_semantics<parallel>], iteration_bounds = array<i64: 2>, scalar_prefetch = 0 : i64, scratch_operands = 0 : i64, tpu.core_type = #tpu.core_type<tc>, window_params = [{transform_indices = @transform_0, window_bounds = array<i64: 4, 8, 128>}, {transform_indices = @transform_1, window_bounds = array<i64: 4, 8, 128>}, {pipeline_mode = #tpu.pipeline_mode<synchronous>, transform_indices = @transform_2, window_bounds = array<i64: 128, 128>}, {pipeline_mode = #tpu.pipeline_mode<synchronous>, transform_indices = @transform_3, window_bounds = array<i64: 128, 128>}, {pipeline_mode = #tpu.pipeline_mode<synchronous>, transform_indices = @transform_4, window_bounds = array<i64: 1, 128>}, {transform_indices = @transform_5, window_bounds = array<i64: 4, 8, 16>}]} {
    %c0 = arith.constant 0 : index
    %c0_0 = arith.constant 0 : index
    %c0_1 = arith.constant 0 : index
    %0 = vector.load %arg1[%c0, %c0_0, %c0_1] : memref<4x8x128xbf16, #tpu.memory_space<vmem>>, vector<4x8x128xbf16>
    %1 = vector.shape_cast %0 : vector<4x8x128xbf16> to vector<32x128xbf16>
    %c0_2 = arith.constant 0 : index
    %c0_3 = arith.constant 0 : index
    %c0_4 = arith.constant 0 : index
    %2 = vector.load %arg2[%c0_2, %c0_3, %c0_4] : memref<4x8x128xbf16, #tpu.memory_space<vmem>>, vector<4x8x128xbf16>
    %3 = vector.shape_cast %2 : vector<4x8x128xbf16> to vector<32x128xbf16>
    %c0_5 = arith.constant 0 : index
    %c0_6 = arith.constant 0 : index
    %4 = vector.load %arg3[%c0_5, %c0_6] : memref<128x128xbf16, #tpu.memory_space<vmem>>, vector<128x128xbf16>
    %cst = arith.constant dense<0.000000e+00> : vector<32x128xf32>
    %5 = tpu.matmul %1, %4, %cst {dimension_numbers = #tpu.dot_dimension_numbers<[1], [0], [0], [1], [0, 0, 1, 1], [], []>} : vector<32x128xbf16>, vector<128x128xbf16>, vector<32x128xf32> -> vector<32x128xf32>
    %c0_7 = arith.constant 0 : index
    %c0_8 = arith.constant 0 : index
    %6 = vector.load %arg4[%c0_7, %c0_8] : memref<128x128xbf16, #tpu.memory_space<vmem>>, vector<128x128xbf16>
    %cst_9 = arith.constant dense<0.000000e+00> : vector<32x128xf32>
    %7 = tpu.matmul %3, %6, %cst_9 {dimension_numbers = #tpu.dot_dimension_numbers<[1], [0], [0], [1], [0, 0, 1, 1], [], []>} : vector<32x128xbf16>, vector<128x128xbf16>, vector<32x128xf32> -> vector<32x128xf32>
    %8 = arith.addf %5, %7 : vector<32x128xf32>
    %c0_10 = arith.constant 0 : index
    %c0_11 = arith.constant 0 : index
    %9 = vector.load %arg5[%c0_10, %c0_11] : memref<1x128xf32, #tpu.memory_space<vmem>>, vector<1x128xf32>
    %10 = vector.broadcast %9 : vector<1x128xf32> to vector<32x128xf32>
    %11 = arith.addf %8, %10 : vector<32x128xf32>
    %cst_12 = arith.constant dense<0xFF800000> : vector<32xf32>
    %12 = vector.multi_reduction <maximumf>, %11, %cst_12 [1] : vector<32x128xf32> to vector<32xf32>
    %13 = vector.shape_cast %12 : vector<32xf32> to vector<32x1xf32>
    %14 = vector.broadcast %13 : vector<32x1xf32> to vector<32x128xf32>
    %15 = arith.subf %11, %14 : vector<32x128xf32>
    %16 = math.exp %15 : vector<32x128xf32>
    %cst_13 = arith.constant dense<0.000000e+00> : vector<32xf32>
    %17 = vector.multi_reduction <add>, %16, %cst_13 [1] : vector<32x128xf32> to vector<32xf32>
    %18 = vector.shape_cast %17 : vector<32xf32> to vector<32x1xf32>
    %19 = math.log %18 : vector<32x1xf32>
    %20 = arith.addf %19, %13 : vector<32x1xf32>
    %21 = vector.broadcast %20 : vector<32x1xf32> to vector<32x128xf32>
    %22 = arith.subf %11, %21 : vector<32x128xf32>
    %23 = vector.shape_cast %22 : vector<32x128xf32> to vector<4x8x128xf32>
    %24 = vector.extract_strided_slice %23 {offsets = [0, 0, 0], sizes = [4, 8, 16], strides = [1, 1, 1]} : vector<4x8x128xf32> to vector<4x8x16xf32>
    %c0_14 = arith.constant 0 : index
    %c0_15 = arith.constant 0 : index
    %c0_16 = arith.constant 0 : index
    %25 = vector.load %arg6[%c0_14, %c0_15, %c0_16] : memref<4x8x16xf32, #tpu.memory_space<vmem>>, vector<4x8x16xf32>
    tpu.vector_store %arg6[%c0_14, %c0_15, %c0_16], %24 {strides = array<i32>} : memref<4x8x16xf32, #tpu.memory_space<vmem>>, vector<4x8x16xf32>,
    return
  }
  func.func @transform_0(%arg0: i32) -> (i32, i32, i32) {
    %c0_i32 = arith.constant 0 : i32
    %c0_i32_0 = arith.constant 0 : i32
    %c0_i32_1 = arith.constant 0 : i32
    return %arg0, %c0_i32, %c0_i32_0 : i32, i32, i32
  }
  func.func @transform_1(%arg0: i32) -> (i32, i32, i32) {
    %c0_i32 = arith.constant 0 : i32
    %c0_i32_0 = arith.constant 0 : i32
    %c0_i32_1 = arith.constant 0 : i32
    return %arg0, %c0_i32, %c0_i32_0 : i32, i32, i32
  }
  func.func @transform_2(%arg0: i32) -> (i32, i32) {
    %c0_i32 = arith.constant 0 : i32
    %c0_i32_0 = arith.constant 0 : i32
    %c0_i32_1 = arith.constant 0 : i32
    return %c0_i32, %c0_i32_0 : i32, i32
  }
  func.func @transform_3(%arg0: i32) -> (i32, i32) {
    %c0_i32 = arith.constant 0 : i32
    %c0_i32_0 = arith.constant 0 : i32
    %c0_i32_1 = arith.constant 0 : i32
    return %c0_i32, %c0_i32_0 : i32, i32
  }
  func.func @transform_4(%arg0: i32) -> (i32, i32) {
    %c0_i32 = arith.constant 0 : i32
    %c0_i32_0 = arith.constant 0 : i32
    %c0_i32_1 = arith.constant 0 : i32
    return %c0_i32, %c0_i32_0 : i32, i32
  }
  func.func @transform_5(%arg0: i32) -> (i32, i32, i32) {
    %c0_i32 = arith.constant 0 : i32
    %c0_i32_0 = arith.constant 0 : i32
    %c0_i32_1 = arith.constant 0 : i32
    return %arg0, %c0_i32, %c0_i32_0 : i32, i32, i32
  }
}

module attributes {stable_mosaic.version = 11 : i64} {
  func.func @encoder_gru_kernel(%arg0: i32, %arg1: memref<8x8x128xbf16, #tpu.memory_space<vmem>>, %arg2: memref<128x384xbf16, #tpu.memory_space<vmem>>, %arg3: memref<128x384xbf16, #tpu.memory_space<vmem>>, %arg4: memref<1x384xf32, #tpu.memory_space<vmem>>, %arg5: memref<1x384xf32, #tpu.memory_space<vmem>>, %arg6: memref<128x128xbf16, #tpu.memory_space<vmem>>, %arg7: memref<8x8x128xbf16, #tpu.memory_space<vmem>>, %arg8: memref<8x8x128xbf16, #tpu.memory_space<vmem>>, %arg9: memref<8x128xf32, #tpu.memory_space<vmem>>, %arg10: memref<8x8x384xf32, #tpu.memory_space<vmem>>) attributes {dimension_semantics = [#tpu.dimension_semantics<arbitrary>], iteration_bounds = array<i64: 1>, scalar_prefetch = 0 : i64, scratch_operands = 1 : i64, tpu.core_type = #tpu.core_type<tc>, window_params = [{pipeline_mode = #tpu.pipeline_mode<synchronous>, transform_indices = @transform_0, window_bounds = array<i64: 8, 8, 128>}, {pipeline_mode = #tpu.pipeline_mode<synchronous>, transform_indices = @transform_1, window_bounds = array<i64: 128, 384>}, {pipeline_mode = #tpu.pipeline_mode<synchronous>, transform_indices = @transform_2, window_bounds = array<i64: 128, 384>}, {pipeline_mode = #tpu.pipeline_mode<synchronous>, transform_indices = @transform_3, window_bounds = array<i64: 1, 384>}, {pipeline_mode = #tpu.pipeline_mode<synchronous>, transform_indices = @transform_4, window_bounds = array<i64: 1, 384>}, {pipeline_mode = #tpu.pipeline_mode<synchronous>, transform_indices = @transform_5, window_bounds = array<i64: 128, 128>}, {pipeline_mode = #tpu.pipeline_mode<synchronous>, transform_indices = @transform_6, window_bounds = array<i64: 8, 8, 128>}, {pipeline_mode = #tpu.pipeline_mode<synchronous>, transform_indices = @transform_7, window_bounds = array<i64: 8, 8, 128>}, {pipeline_mode = #tpu.pipeline_mode<synchronous>, transform_indices = @transform_8, window_bounds = array<i64: 8, 128>}]} {
    %c0 = arith.constant 0 : index
    %c0_0 = arith.constant 0 : index
    %c0_1 = arith.constant 0 : index
    %0 = vector.load %arg1[%c0, %c0_0, %c0_1] : memref<8x8x128xbf16, #tpu.memory_space<vmem>>, vector<8x8x128xbf16>
    %1 = vector.shape_cast %0 : vector<8x8x128xbf16> to vector<64x128xbf16>
    %c0_2 = arith.constant 0 : index
    %c0_3 = arith.constant 0 : index
    %2 = vector.load %arg2[%c0_2, %c0_3] : memref<128x384xbf16, #tpu.memory_space<vmem>>, vector<128x384xbf16>
    %cst = arith.constant dense<0.000000e+00> : vector<64x384xf32>
    %3 = tpu.matmul %1, %2, %cst {dimension_numbers = #tpu.dot_dimension_numbers<[1], [0], [0], [1], [0, 0, 1, 1], [], []>} : vector<64x128xbf16>, vector<128x384xbf16>, vector<64x384xf32> -> vector<64x384xf32>
    %c0_4 = arith.constant 0 : index
    %c0_5 = arith.constant 0 : index
    %4 = vector.load %arg4[%c0_4, %c0_5] : memref<1x384xf32, #tpu.memory_space<vmem>>, vector<1x384xf32>
    %5 = vector.broadcast %4 : vector<1x384xf32> to vector<64x384xf32>
    %6 = arith.addf %3, %5 : vector<64x384xf32>
    %7 = vector.shape_cast %6 : vector<64x384xf32> to vector<8x8x384xf32>
    %c0_6 = arith.constant 0 : index
    %c0_7 = arith.constant 0 : index
    %c0_8 = arith.constant 0 : index
    %8 = vector.load %arg10[%c0_6, %c0_7, %c0_8] : memref<8x8x384xf32, #tpu.memory_space<vmem>>, vector<8x8x384xf32>
    tpu.vector_store %arg10[%c0_6, %c0_7, %c0_8], %7 {strides = array<i32>} : memref<8x8x384xf32, #tpu.memory_space<vmem>>, vector<8x8x384xf32>,
    %c0_9 = arith.constant 0 : index
    %c0_10 = arith.constant 0 : index
    %9 = vector.load %arg5[%c0_9, %c0_10] : memref<1x384xf32, #tpu.memory_space<vmem>>, vector<1x384xf32>
    %10 = vector.shape_cast %9 : vector<1x384xf32> to vector<1x384xf32>
    %11 = vector.broadcast %10 : vector<1x384xf32> to vector<8x384xf32>
    %cst_11 = arith.constant 0.000000e+00 : f32
    %12 = vector.broadcast %cst_11 : f32 to vector<8x128xf32>
    %c0_i32 = arith.constant 0 : i32
    %c8_i32 = arith.constant 8 : i32
    %13 = arith.addi %c0_i32, %c8_i32 : i32
    %c1_i32 = arith.constant 1 : i32
    %14 = scf.for %arg11 = %c0_i32 to %13 step %c1_i32 iter_args(%arg12 = %12) -> (vector<8x128xf32>)  : i32 {
      %23 = arith.index_cast %arg11 : i32 to index
      %c0_24 = arith.constant 0 : index
      %c0_25 = arith.constant 0 : index
      %24 = vector.load %arg10[%23, %c0_24, %c0_25] : memref<8x8x384xf32, #tpu.memory_space<vmem>>, vector<1x8x384xf32>
      %25 = vector.shape_cast %24 : vector<1x8x384xf32> to vector<8x384xf32>
      %26 = arith.truncf %arg12 : vector<8x128xf32> to vector<8x128xbf16>
      %c0_26 = arith.constant 0 : index
      %c0_27 = arith.constant 0 : index
      %27 = vector.load %arg3[%c0_26, %c0_27] : memref<128x384xbf16, #tpu.memory_space<vmem>>, vector<128x384xbf16>
      %cst_28 = arith.constant dense<0.000000e+00> : vector<8x384xf32>
      %28 = tpu.matmul %26, %27, %cst_28 {dimension_numbers = #tpu.dot_dimension_numbers<[1], [0], [0], [1], [0, 0, 1, 1], [], []>} : vector<8x128xbf16>, vector<128x384xbf16>, vector<8x384xf32> -> vector<8x384xf32>
      %29 = arith.addf %28, %11 : vector<8x384xf32>
      %30 = vector.extract_strided_slice %25 {offsets = [0, 0], sizes = [8, 128], strides = [1, 1]} : vector<8x384xf32> to vector<8x128xf32>
      %31 = vector.extract_strided_slice %29 {offsets = [0, 0], sizes = [8, 128], strides = [1, 1]} : vector<8x384xf32> to vector<8x128xf32>
      %32 = arith.addf %30, %31 : vector<8x128xf32>
      %33 = arith.negf %32 : vector<8x128xf32>
      %34 = math.exp %33 : vector<8x128xf32>
      %cst_29 = arith.constant 1.000000e+00 : f32
      %35 = vector.broadcast %cst_29 : f32 to vector<8x128xf32>
      %36 = arith.addf %35, %34 : vector<8x128xf32>
      %37 = arith.divf %35, %36 : vector<8x128xf32>
      %38 = vector.extract_strided_slice %25 {offsets = [0, 128], sizes = [8, 128], strides = [1, 1]} : vector<8x384xf32> to vector<8x128xf32>
      %39 = vector.extract_strided_slice %29 {offsets = [0, 128], sizes = [8, 128], strides = [1, 1]} : vector<8x384xf32> to vector<8x128xf32>
      %40 = arith.addf %38, %39 : vector<8x128xf32>
      %41 = arith.negf %40 : vector<8x128xf32>
      %42 = math.exp %41 : vector<8x128xf32>
      %cst_30 = arith.constant 1.000000e+00 : f32
      %43 = vector.broadcast %cst_30 : f32 to vector<8x128xf32>
      %44 = arith.addf %43, %42 : vector<8x128xf32>
      %45 = arith.divf %43, %44 : vector<8x128xf32>
      %46 = vector.extract_strided_slice %25 {offsets = [0, 256], sizes = [8, 128], strides = [1, 1]} : vector<8x384xf32> to vector<8x128xf32>
      %47 = vector.extract_strided_slice %29 {offsets = [0, 256], sizes = [8, 128], strides = [1, 1]} : vector<8x384xf32> to vector<8x128xf32>
      %48 = arith.mulf %37, %47 : vector<8x128xf32>
      %49 = arith.addf %46, %48 : vector<8x128xf32>
      %50 = math.tanh %49 : vector<8x128xf32>
      %cst_31 = arith.constant 1.000000e+00 : f32
      %51 = vector.broadcast %cst_31 : f32 to vector<8x128xf32>
      %52 = arith.subf %51, %45 : vector<8x128xf32>
      %53 = arith.mulf %52, %50 : vector<8x128xf32>
      %54 = arith.mulf %45, %arg12 : vector<8x128xf32>
      %55 = arith.addf %53, %54 : vector<8x128xf32>
      %56 = arith.truncf %55 : vector<8x128xf32> to vector<8x128xbf16>
      %57 = arith.index_cast %arg11 : i32 to index
      %c0_32 = arith.constant 0 : index
      %c0_33 = arith.constant 0 : index
      %58 = vector.load %arg7[%57, %c0_32, %c0_33] : memref<8x8x128xbf16, #tpu.memory_space<vmem>>, vector<1x8x128xbf16>
      %59 = vector.shape_cast %58 : vector<1x8x128xbf16> to vector<8x128xbf16>
      %60 = vector.shape_cast %56 : vector<8x128xbf16> to vector<1x8x128xbf16>
      tpu.vector_store %arg7[%57, %c0_32, %c0_33], %60 {strides = array<i32>} : memref<8x8x128xbf16, #tpu.memory_space<vmem>>, vector<1x8x128xbf16>,
      scf.yield %55 : vector<8x128xf32>
    }
    %c8_i32_12 = arith.constant 8 : i32
    %c0_13 = arith.constant 0 : index
    %c0_14 = arith.constant 0 : index
    %15 = vector.load %arg9[%c0_13, %c0_14] : memref<8x128xf32, #tpu.memory_space<vmem>>, vector<8x128xf32>
    tpu.vector_store %arg9[%c0_13, %c0_14], %14 {strides = array<i32>} : memref<8x128xf32, #tpu.memory_space<vmem>>, vector<8x128xf32>,
    %c0_15 = arith.constant 0 : index
    %c0_16 = arith.constant 0 : index
    %c0_17 = arith.constant 0 : index
    %16 = vector.load %arg7[%c0_15, %c0_16, %c0_17] : memref<8x8x128xbf16, #tpu.memory_space<vmem>>, vector<8x8x128xbf16>
    %17 = vector.shape_cast %16 : vector<8x8x128xbf16> to vector<64x128xbf16>
    %c0_18 = arith.constant 0 : index
    %c0_19 = arith.constant 0 : index
    %18 = vector.load %arg6[%c0_18, %c0_19] : memref<128x128xbf16, #tpu.memory_space<vmem>>, vector<128x128xbf16>
    %cst_20 = arith.constant dense<0.000000e+00> : vector<64x128xf32>
    %19 = tpu.matmul %17, %18, %cst_20 {dimension_numbers = #tpu.dot_dimension_numbers<[1], [0], [0], [1], [0, 0, 1, 1], [], []>} : vector<64x128xbf16>, vector<128x128xbf16>, vector<64x128xf32> -> vector<64x128xf32>
    %20 = arith.truncf %19 : vector<64x128xf32> to vector<64x128xbf16>
    %21 = vector.shape_cast %20 : vector<64x128xbf16> to vector<8x8x128xbf16>
    %c0_21 = arith.constant 0 : index
    %c0_22 = arith.constant 0 : index
    %c0_23 = arith.constant 0 : index
    %22 = vector.load %arg8[%c0_21, %c0_22, %c0_23] : memref<8x8x128xbf16, #tpu.memory_space<vmem>>, vector<8x8x128xbf16>
    tpu.vector_store %arg8[%c0_21, %c0_22, %c0_23], %21 {strides = array<i32>} : memref<8x8x128xbf16, #tpu.memory_space<vmem>>, vector<8x8x128xbf16>,
    return
  }
  func.func @transform_0(%arg0: i32) -> (i32, i32, i32) {
    %c0_i32 = arith.constant 0 : i32
    %c0_i32_0 = arith.constant 0 : i32
    %c0_i32_1 = arith.constant 0 : i32
    %c0_i32_2 = arith.constant 0 : i32
    return %c0_i32, %c0_i32_0, %c0_i32_1 : i32, i32, i32
  }
  func.func @transform_1(%arg0: i32) -> (i32, i32) {
    %c0_i32 = arith.constant 0 : i32
    %c0_i32_0 = arith.constant 0 : i32
    %c0_i32_1 = arith.constant 0 : i32
    return %c0_i32, %c0_i32_0 : i32, i32
  }
  func.func @transform_2(%arg0: i32) -> (i32, i32) {
    %c0_i32 = arith.constant 0 : i32
    %c0_i32_0 = arith.constant 0 : i32
    %c0_i32_1 = arith.constant 0 : i32
    return %c0_i32, %c0_i32_0 : i32, i32
  }
  func.func @transform_3(%arg0: i32) -> (i32, i32) {
    %c0_i32 = arith.constant 0 : i32
    %c0_i32_0 = arith.constant 0 : i32
    %c0_i32_1 = arith.constant 0 : i32
    return %c0_i32, %c0_i32_0 : i32, i32
  }
  func.func @transform_4(%arg0: i32) -> (i32, i32) {
    %c0_i32 = arith.constant 0 : i32
    %c0_i32_0 = arith.constant 0 : i32
    %c0_i32_1 = arith.constant 0 : i32
    return %c0_i32, %c0_i32_0 : i32, i32
  }
  func.func @transform_5(%arg0: i32) -> (i32, i32) {
    %c0_i32 = arith.constant 0 : i32
    %c0_i32_0 = arith.constant 0 : i32
    %c0_i32_1 = arith.constant 0 : i32
    return %c0_i32, %c0_i32_0 : i32, i32
  }
  func.func @transform_6(%arg0: i32) -> (i32, i32, i32) {
    %c0_i32 = arith.constant 0 : i32
    %c0_i32_0 = arith.constant 0 : i32
    %c0_i32_1 = arith.constant 0 : i32
    %c0_i32_2 = arith.constant 0 : i32
    return %c0_i32, %c0_i32_0, %c0_i32_1 : i32, i32, i32
  }
  func.func @transform_7(%arg0: i32) -> (i32, i32, i32) {
    %c0_i32 = arith.constant 0 : i32
    %c0_i32_0 = arith.constant 0 : i32
    %c0_i32_1 = arith.constant 0 : i32
    %c0_i32_2 = arith.constant 0 : i32
    return %c0_i32, %c0_i32_0, %c0_i32_1 : i32, i32, i32
  }
  func.func @transform_8(%arg0: i32) -> (i32, i32) {
    %c0_i32 = arith.constant 0 : i32
    %c0_i32_0 = arith.constant 0 : i32
    %c0_i32_1 = arith.constant 0 : i32
    return %c0_i32, %c0_i32_0 : i32, i32
  }
}

module attributes {stable_mosaic.version = 11 : i64} {
  func.func @attn_decoder_kernel(%arg0: i32, %arg1: memref<8x8x128xbf16, #tpu.memory_space<vmem>>, %arg2: memref<8x128xf32, #tpu.memory_space<vmem>>, %arg3: memref<8x8x128xbf16, #tpu.memory_space<vmem>>, %arg4: memref<8x8x128xbf16, #tpu.memory_space<vmem>>, %arg5: memref<128x512xbf16, #tpu.memory_space<vmem>>, %arg6: memref<1x512xf32, #tpu.memory_space<vmem>>, %arg7: memref<1x128xf32, #tpu.memory_space<vmem>>, %arg8: memref<128x384xbf16, #tpu.memory_space<vmem>>, %arg9: memref<128x384xbf16, #tpu.memory_space<vmem>>, %arg10: memref<1x384xf32, #tpu.memory_space<vmem>>, %arg11: memref<8x8x128xbf16, #tpu.memory_space<vmem>>, %arg12: memref<8x8x128xbf16, #tpu.memory_space<vmem>>, %arg13: memref<8x8x384xf32, #tpu.memory_space<vmem>>) attributes {dimension_semantics = [#tpu.dimension_semantics<arbitrary>], iteration_bounds = array<i64: 1>, scalar_prefetch = 0 : i64, scratch_operands = 1 : i64, tpu.core_type = #tpu.core_type<tc>, window_params = [{pipeline_mode = #tpu.pipeline_mode<synchronous>, transform_indices = @transform_0, window_bounds = array<i64: 8, 8, 128>}, {pipeline_mode = #tpu.pipeline_mode<synchronous>, transform_indices = @transform_1, window_bounds = array<i64: 8, 128>}, {pipeline_mode = #tpu.pipeline_mode<synchronous>, transform_indices = @transform_2, window_bounds = array<i64: 8, 8, 128>}, {pipeline_mode = #tpu.pipeline_mode<synchronous>, transform_indices = @transform_3, window_bounds = array<i64: 8, 8, 128>}, {pipeline_mode = #tpu.pipeline_mode<synchronous>, transform_indices = @transform_4, window_bounds = array<i64: 128, 512>}, {pipeline_mode = #tpu.pipeline_mode<synchronous>, transform_indices = @transform_5, window_bounds = array<i64: 1, 512>}, {pipeline_mode = #tpu.pipeline_mode<synchronous>, transform_indices = @transform_6, window_bounds = array<i64: 1, 128>}, {pipeline_mode = #tpu.pipeline_mode<synchronous>, transform_indices = @transform_7, window_bounds = array<i64: 128, 384>}, {pipeline_mode = #tpu.pipeline_mode<synchronous>, transform_indices = @transform_8, window_bounds = array<i64: 128, 384>}, {pipeline_mode = #tpu.pipeline_mode<synchronous>, transform_indices = @transform_9, window_bounds = array<i64: 1, 384>}, {pipeline_mode = #tpu.pipeline_mode<synchronous>, transform_indices = @transform_10, window_bounds = array<i64: 8, 8, 128>}, {pipeline_mode = #tpu.pipeline_mode<synchronous>, transform_indices = @transform_11, window_bounds = array<i64: 8, 8, 128>}]} {
    %c0 = arith.constant 0 : index
    %c0_0 = arith.constant 0 : index
    %c0_1 = arith.constant 0 : index
    %0 = vector.load %arg1[%c0, %c0_0, %c0_1] : memref<8x8x128xbf16, #tpu.memory_space<vmem>>, vector<8x8x128xbf16>
    %1 = vector.shape_cast %0 : vector<8x8x128xbf16> to vector<64x128xbf16>
    %c0_2 = arith.constant 0 : index
    %c0_3 = arith.constant 0 : index
    %2 = vector.load %arg8[%c0_2, %c0_3] : memref<128x384xbf16, #tpu.memory_space<vmem>>, vector<128x384xbf16>
    %cst = arith.constant dense<0.000000e+00> : vector<64x384xf32>
    %3 = tpu.matmul %1, %2, %cst {dimension_numbers = #tpu.dot_dimension_numbers<[1], [0], [0], [1], [0, 0, 1, 1], [], []>} : vector<64x128xbf16>, vector<128x384xbf16>, vector<64x384xf32> -> vector<64x384xf32>
    %c0_4 = arith.constant 0 : index
    %c0_5 = arith.constant 0 : index
    %4 = vector.load %arg10[%c0_4, %c0_5] : memref<1x384xf32, #tpu.memory_space<vmem>>, vector<1x384xf32>
    %5 = vector.broadcast %4 : vector<1x384xf32> to vector<64x384xf32>
    %6 = arith.addf %3, %5 : vector<64x384xf32>
    %7 = vector.shape_cast %6 : vector<64x384xf32> to vector<8x8x384xf32>
    %c0_6 = arith.constant 0 : index
    %c0_7 = arith.constant 0 : index
    %c0_8 = arith.constant 0 : index
    %8 = vector.load %arg13[%c0_6, %c0_7, %c0_8] : memref<8x8x384xf32, #tpu.memory_space<vmem>>, vector<8x8x384xf32>
    tpu.vector_store %arg13[%c0_6, %c0_7, %c0_8], %7 {strides = array<i32>} : memref<8x8x384xf32, #tpu.memory_space<vmem>>, vector<8x8x384xf32>,
    %c0_9 = arith.constant 0 : index
    %c0_10 = arith.constant 0 : index
    %9 = vector.load %arg7[%c0_9, %c0_10] : memref<1x128xf32, #tpu.memory_space<vmem>>, vector<1x128xf32>
    %10 = vector.shape_cast %9 : vector<1x128xf32> to vector<1x1x128xf32>
    %c0_11 = arith.constant 0 : index
    %c0_12 = arith.constant 0 : index
    %11 = vector.load %arg6[%c0_11, %c0_12] : memref<1x512xf32, #tpu.memory_space<vmem>>, vector<1x512xf32>
    %12 = vector.shape_cast %11 : vector<1x512xf32> to vector<1x512xf32>
    %13 = vector.broadcast %12 : vector<1x512xf32> to vector<8x512xf32>
    %c0_13 = arith.constant 0 : index
    %c0_14 = arith.constant 0 : index
    %14 = vector.load %arg2[%c0_13, %c0_14] : memref<8x128xf32, #tpu.memory_space<vmem>>, vector<8x128xf32>
    %c0_i32 = arith.constant 0 : i32
    %c8_i32 = arith.constant 8 : i32
    %15 = arith.addi %c0_i32, %c8_i32 : i32
    %c1_i32 = arith.constant 1 : i32
    %16 = scf.for %arg14 = %c0_i32 to %15 step %c1_i32 iter_args(%arg15 = %14) -> (vector<8x128xf32>)  : i32 {
      %17 = arith.truncf %arg15 : vector<8x128xf32> to vector<8x128xbf16>
      %c0_16 = arith.constant 0 : index
      %c0_17 = arith.constant 0 : index
      %18 = vector.load %arg5[%c0_16, %c0_17] : memref<128x512xbf16, #tpu.memory_space<vmem>>, vector<128x512xbf16>
      %cst_18 = arith.constant dense<0.000000e+00> : vector<8x512xf32>
      %19 = tpu.matmul %17, %18, %cst_18 {dimension_numbers = #tpu.dot_dimension_numbers<[1], [0], [0], [1], [0, 0, 1, 1], [], []>} : vector<8x128xbf16>, vector<128x512xbf16>, vector<8x512xf32> -> vector<8x512xf32>
      %20 = arith.addf %19, %13 : vector<8x512xf32>
      %21 = vector.extract_strided_slice %20 {offsets = [0, 0], sizes = [8, 128], strides = [1, 1]} : vector<8x512xf32> to vector<8x128xf32>
      %22 = vector.extract_strided_slice %20 {offsets = [0, 128], sizes = [8, 384], strides = [1, 1]} : vector<8x512xf32> to vector<8x384xf32>
      %c0_19 = arith.constant 0 : index
      %c0_20 = arith.constant 0 : index
      %c0_21 = arith.constant 0 : index
      %23 = vector.load %arg4[%c0_19, %c0_20, %c0_21] : memref<8x8x128xbf16, #tpu.memory_space<vmem>>, vector<8x8x128xbf16>
      %24 = arith.extf %23 : vector<8x8x128xbf16> to vector<8x8x128xf32>
      %25 = vector.shape_cast %21 : vector<8x128xf32> to vector<1x8x128xf32>
      %26 = vector.broadcast %25 : vector<1x8x128xf32> to vector<8x8x128xf32>
      %27 = arith.addf %24, %26 : vector<8x8x128xf32>
      %28 = math.tanh %27 : vector<8x8x128xf32>
      %29 = vector.broadcast %10 : vector<1x1x128xf32> to vector<8x8x128xf32>
      %30 = arith.mulf %28, %29 : vector<8x8x128xf32>
      %cst_22 = arith.constant dense<0.000000e+00> : vector<8x8xf32>
      %31 = vector.multi_reduction <add>, %30, %cst_22 [2] : vector<8x8x128xf32> to vector<8x8xf32>
      %32 = vector.shape_cast %31 : vector<8x8xf32> to vector<8x8x1xf32>
      %cst_23 = arith.constant dense<0xFF800000> : vector<8x1xf32>
      %33 = vector.multi_reduction <maximumf>, %32, %cst_23 [0] : vector<8x8x1xf32> to vector<8x1xf32>
      %34 = vector.shape_cast %33 : vector<8x1xf32> to vector<1x8x1xf32>
      %35 = vector.broadcast %34 : vector<1x8x1xf32> to vector<8x8x1xf32>
      %36 = arith.subf %32, %35 : vector<8x8x1xf32>
      %37 = math.exp %36 : vector<8x8x1xf32>
      %cst_24 = arith.constant dense<0.000000e+00> : vector<8x1xf32>
      %38 = vector.multi_reduction <add>, %37, %cst_24 [0] : vector<8x8x1xf32> to vector<8x1xf32>
      %39 = vector.shape_cast %38 : vector<8x1xf32> to vector<1x8x1xf32>
      %40 = tpu.reciprocal %39 {approx = true} : vector<1x8x1xf32> -> vector<1x8x1xf32>
      %41 = vector.broadcast %40 : vector<1x8x1xf32> to vector<8x8x1xf32>
      %42 = arith.mulf %37, %41 : vector<8x8x1xf32>
      %c0_25 = arith.constant 0 : index
      %c0_26 = arith.constant 0 : index
      %c0_27 = arith.constant 0 : index
      %43 = vector.load %arg3[%c0_25, %c0_26, %c0_27] : memref<8x8x128xbf16, #tpu.memory_space<vmem>>, vector<8x8x128xbf16>
      %44 = arith.extf %43 : vector<8x8x128xbf16> to vector<8x8x128xf32>
      %45 = vector.broadcast %42 : vector<8x8x1xf32> to vector<8x8x128xf32>
      %46 = arith.mulf %45, %44 : vector<8x8x128xf32>
      %cst_28 = arith.constant dense<0.000000e+00> : vector<8x128xf32>
      %47 = vector.multi_reduction <add>, %46, %cst_28 [0] : vector<8x8x128xf32> to vector<8x128xf32>
      %48 = arith.index_cast %arg14 : i32 to index
      %c0_29 = arith.constant 0 : index
      %c0_30 = arith.constant 0 : index
      %49 = vector.load %arg13[%48, %c0_29, %c0_30] : memref<8x8x384xf32, #tpu.memory_space<vmem>>, vector<1x8x384xf32>
      %50 = vector.shape_cast %49 : vector<1x8x384xf32> to vector<8x384xf32>
      %51 = arith.truncf %47 : vector<8x128xf32> to vector<8x128xbf16>
      %c0_31 = arith.constant 0 : index
      %c0_32 = arith.constant 0 : index
      %52 = vector.load %arg9[%c0_31, %c0_32] : memref<128x384xbf16, #tpu.memory_space<vmem>>, vector<128x384xbf16>
      %cst_33 = arith.constant dense<0.000000e+00> : vector<8x384xf32>
      %53 = tpu.matmul %51, %52, %cst_33 {dimension_numbers = #tpu.dot_dimension_numbers<[1], [0], [0], [1], [0, 0, 1, 1], [], []>} : vector<8x128xbf16>, vector<128x384xbf16>, vector<8x384xf32> -> vector<8x384xf32>
      %54 = arith.addf %50, %53 : vector<8x384xf32>
      %55 = vector.extract_strided_slice %54 {offsets = [0, 0], sizes = [8, 128], strides = [1, 1]} : vector<8x384xf32> to vector<8x128xf32>
      %56 = vector.extract_strided_slice %22 {offsets = [0, 0], sizes = [8, 128], strides = [1, 1]} : vector<8x384xf32> to vector<8x128xf32>
      %57 = arith.addf %55, %56 : vector<8x128xf32>
      %58 = arith.negf %57 : vector<8x128xf32>
      %59 = math.exp %58 : vector<8x128xf32>
      %cst_34 = arith.constant 1.000000e+00 : f32
      %60 = vector.broadcast %cst_34 : f32 to vector<8x128xf32>
      %61 = arith.addf %60, %59 : vector<8x128xf32>
      %62 = arith.divf %60, %61 : vector<8x128xf32>
      %63 = vector.extract_strided_slice %54 {offsets = [0, 128], sizes = [8, 128], strides = [1, 1]} : vector<8x384xf32> to vector<8x128xf32>
      %64 = vector.extract_strided_slice %22 {offsets = [0, 128], sizes = [8, 128], strides = [1, 1]} : vector<8x384xf32> to vector<8x128xf32>
      %65 = arith.addf %63, %64 : vector<8x128xf32>
      %66 = arith.negf %65 : vector<8x128xf32>
      %67 = math.exp %66 : vector<8x128xf32>
      %cst_35 = arith.constant 1.000000e+00 : f32
      %68 = vector.broadcast %cst_35 : f32 to vector<8x128xf32>
      %69 = arith.addf %68, %67 : vector<8x128xf32>
      %70 = arith.divf %68, %69 : vector<8x128xf32>
      %71 = vector.extract_strided_slice %54 {offsets = [0, 256], sizes = [8, 128], strides = [1, 1]} : vector<8x384xf32> to vector<8x128xf32>
      %72 = vector.extract_strided_slice %22 {offsets = [0, 256], sizes = [8, 128], strides = [1, 1]} : vector<8x384xf32> to vector<8x128xf32>
      %73 = arith.mulf %62, %72 : vector<8x128xf32>
      %74 = arith.addf %71, %73 : vector<8x128xf32>
      %75 = math.tanh %74 : vector<8x128xf32>
      %cst_36 = arith.constant 1.000000e+00 : f32
      %76 = vector.broadcast %cst_36 : f32 to vector<8x128xf32>
      %77 = arith.subf %76, %70 : vector<8x128xf32>
      %78 = arith.mulf %77, %75 : vector<8x128xf32>
      %79 = arith.mulf %70, %arg15 : vector<8x128xf32>
      %80 = arith.addf %78, %79 : vector<8x128xf32>
      %81 = arith.truncf %80 : vector<8x128xf32> to vector<8x128xbf16>
      %82 = arith.index_cast %arg14 : i32 to index
      %c0_37 = arith.constant 0 : index
      %c0_38 = arith.constant 0 : index
      %83 = vector.load %arg11[%82, %c0_37, %c0_38] : memref<8x8x128xbf16, #tpu.memory_space<vmem>>, vector<1x8x128xbf16>
      %84 = vector.shape_cast %83 : vector<1x8x128xbf16> to vector<8x128xbf16>
      %85 = vector.shape_cast %81 : vector<8x128xbf16> to vector<1x8x128xbf16>
      tpu.vector_store %arg11[%82, %c0_37, %c0_38], %85 {strides = array<i32>} : memref<8x8x128xbf16, #tpu.memory_space<vmem>>, vector<1x8x128xbf16>,
      %86 = arith.truncf %47 : vector<8x128xf32> to vector<8x128xbf16>
      %87 = arith.index_cast %arg14 : i32 to index
      %c0_39 = arith.constant 0 : index
      %c0_40 = arith.constant 0 : index
      %88 = vector.load %arg12[%87, %c0_39, %c0_40] : memref<8x8x128xbf16, #tpu.memory_space<vmem>>, vector<1x8x128xbf16>
      %89 = vector.shape_cast %88 : vector<1x8x128xbf16> to vector<8x128xbf16>
      %90 = vector.shape_cast %86 : vector<8x128xbf16> to vector<1x8x128xbf16>
      tpu.vector_store %arg12[%87, %c0_39, %c0_40], %90 {strides = array<i32>} : memref<8x8x128xbf16, #tpu.memory_space<vmem>>, vector<1x8x128xbf16>,
      scf.yield %80 : vector<8x128xf32>
    }
    %c8_i32_15 = arith.constant 8 : i32
    return
  }
  func.func @transform_0(%arg0: i32) -> (i32, i32, i32) {
    %c0_i32 = arith.constant 0 : i32
    %c0_i32_0 = arith.constant 0 : i32
    %c0_i32_1 = arith.constant 0 : i32
    %c0_i32_2 = arith.constant 0 : i32
    return %c0_i32, %c0_i32_0, %c0_i32_1 : i32, i32, i32
  }
  func.func @transform_1(%arg0: i32) -> (i32, i32) {
    %c0_i32 = arith.constant 0 : i32
    %c0_i32_0 = arith.constant 0 : i32
    %c0_i32_1 = arith.constant 0 : i32
    return %c0_i32, %c0_i32_0 : i32, i32
  }
  func.func @transform_2(%arg0: i32) -> (i32, i32, i32) {
    %c0_i32 = arith.constant 0 : i32
    %c0_i32_0 = arith.constant 0 : i32
    %c0_i32_1 = arith.constant 0 : i32
    %c0_i32_2 = arith.constant 0 : i32
    return %c0_i32, %c0_i32_0, %c0_i32_1 : i32, i32, i32
  }
  func.func @transform_3(%arg0: i32) -> (i32, i32, i32) {
    %c0_i32 = arith.constant 0 : i32
    %c0_i32_0 = arith.constant 0 : i32
    %c0_i32_1 = arith.constant 0 : i32
    %c0_i32_2 = arith.constant 0 : i32
    return %c0_i32, %c0_i32_0, %c0_i32_1 : i32, i32, i32
  }
  func.func @transform_4(%arg0: i32) -> (i32, i32) {
    %c0_i32 = arith.constant 0 : i32
    %c0_i32_0 = arith.constant 0 : i32
    %c0_i32_1 = arith.constant 0 : i32
    return %c0_i32, %c0_i32_0 : i32, i32
  }
  func.func @transform_5(%arg0: i32) -> (i32, i32) {
    %c0_i32 = arith.constant 0 : i32
    %c0_i32_0 = arith.constant 0 : i32
    %c0_i32_1 = arith.constant 0 : i32
    return %c0_i32, %c0_i32_0 : i32, i32
  }
  func.func @transform_6(%arg0: i32) -> (i32, i32) {
    %c0_i32 = arith.constant 0 : i32
    %c0_i32_0 = arith.constant 0 : i32
    %c0_i32_1 = arith.constant 0 : i32
    return %c0_i32, %c0_i32_0 : i32, i32
  }
  func.func @transform_7(%arg0: i32) -> (i32, i32) {
    %c0_i32 = arith.constant 0 : i32
    %c0_i32_0 = arith.constant 0 : i32
    %c0_i32_1 = arith.constant 0 : i32
    return %c0_i32, %c0_i32_0 : i32, i32
  }
  func.func @transform_8(%arg0: i32) -> (i32, i32) {
    %c0_i32 = arith.constant 0 : i32
    %c0_i32_0 = arith.constant 0 : i32
    %c0_i32_1 = arith.constant 0 : i32
    return %c0_i32, %c0_i32_0 : i32, i32
  }
  func.func @transform_9(%arg0: i32) -> (i32, i32) {
    %c0_i32 = arith.constant 0 : i32
    %c0_i32_0 = arith.constant 0 : i32
    %c0_i32_1 = arith.constant 0 : i32
    return %c0_i32, %c0_i32_0 : i32, i32
  }
  func.func @transform_10(%arg0: i32) -> (i32, i32, i32) {
    %c0_i32 = arith.constant 0 : i32
    %c0_i32_0 = arith.constant 0 : i32
    %c0_i32_1 = arith.constant 0 : i32
    %c0_i32_2 = arith.constant 0 : i32
    return %c0_i32, %c0_i32_0, %c0_i32_1 : i32, i32, i32
  }
  func.func @transform_11(%arg0: i32) -> (i32, i32, i32) {
    %c0_i32 = arith.constant 0 : i32
    %c0_i32_0 = arith.constant 0 : i32
    %c0_i32_1 = arith.constant 0 : i32
    %c0_i32_2 = arith.constant 0 : i32
    return %c0_i32, %c0_i32_0, %c0_i32_1 : i32, i32, i32
  }
}

</mosaic_0001>

<bundles_post_ra>
// kernel: seq2seq_forward.5
= control target key start
LH: loop header
LB: loop body
LE: loop exit
PB: predicated region body
PF: predicated region fallthrough
CT: control target
= control target key end

     0   :  { %10 = vsyncpa [#allocation3], 0  ;;  %s1029_s0 = inlined_call_operand.vmem [shape: bf16[8,8,128], index: 0, kind: input, shape index: {}]   ;;  %s1030_s1 = inlined_call_operand.vmem [shape: bf16[8,8,128], index: 1, kind: input, shape index: {}]   ;;  %s1031_s2 = inlined_call_operand.vmem [shape: bf16[128,128], index: 2, kind: input, shape index: {}]   ;;  %s1032_s3 = inlined_call_operand.vmem [shape: bf16[128,128], index: 3, kind: input, shape index: {}]   ;;  %s1033_s4 = inlined_call_operand.vmem [shape: f32[1,128], index: 4, kind: input, shape index: {}]   ;;  %s1034_s5 = inlined_call_operand.hbm [shape: f32[8,8,16], index: 5, kind: output, shape index: {}]  }
   0x1   :  { %12 = vsyncpa [#allocation3 + $0x1], 0  ;;  %s878_s18 = smov 0   ;;  %s880_s19 = smov 0  }
   0x2   :  { %s882_s20 = smov 0   ;;  %s884_s21 = smov 0  }
   0x3 LB: > { %s899_s22 = sadd.s32 4294967295, %s844_s21   ;;  %s593_s23 = sadd.s32 4294967294, %s844_s21   ;;  %s844_s21 = sphi %s884_s21, %s1040_s21   ;;  %s840_s20 = sphi %s882_s20, %s1039_s20   ;;  %s836_s19 = sphi %s880_s19, %s1038_s19   ;;  %s832_s18 = sphi %s878_s18, %s1037_s18  }
   0x4   : > { %s903_s24 = sadd.s32 1, %s844_s21   ;;  %s140_s25 = sadd.s32 1, %s840_s20 }
   0x5   : > { %s137_s26 = ssub.s32 %s844_s21, %s903_s24  ;;  %p150_p0 = scmp.ne.s32.totalorder %s840_s20, %s836_s19 }
   0x6   : > { %p138_p1 = scmp.eq.s32.totalorder %s137_s26, 0  ;;  %p151_p2 = scmp.eq.s32.totalorder %s899_s22, 1 }
   0x7   : > { %p156_p3 = scmp.ne.s32.totalorder %s836_s19, %s832_s18  ;;  %p157_p4 = scmp.eq.s32.totalorder %s593_s23, 1 }
   0x8   : > { %s914_s27 = scalar_select %p138_p1, %s840_s20, %s140_s25  }
   0x9   : > { %p916_p5 = por %p151_p2, %p150_p0  ;;  %p920_p6 = por %p157_p4, %p156_p3 }
   0xa   : > { %p596_p7 = scmp.ge.s32.totalorder %s844_s21, 1  ;;  %p202_p8 = scmp.lt.s32.totalorder %s844_s21, 3 }
   0xc   : > { %p203_p9 = pnand %p596_p7, %p202_p8 }
   0xd   : > { %s598_s30 = sshll.u32 (!%p203_p9), %s899_s22, 2  ;;  %s232_s15 = sand.u32 (!%p203_p9), 1, %s836_s19  }
   0xe   : > { %206 = sbr.rel (%p203_p9) target bundleno = 456 (0x1c8), region = 40  ;;  %p236_p10 = scmp.lt.s32.totalorder (!%p203_p9), %s598_s30, 7 }
   0xf   : > { %s597_s16 = sshll.u32 (!%p203_p9), %s232_s15, 5 }
  0x10   : > { %s234_s17 = scalar_lea.vmem (!%p203_p9), [#allocation2], %s597_s16 }
  0x11   : > { %s516_s7 = sshll.u32 (!%p203_p9), %s234_s17, 4  ;;  %s517_s7 = int_to_ptr.vmem [resolvable:$true] %s516_s7 }
  0x13   : > { %v706_v0 = vld [vmem:[%s1032_s3 + $0x38] sm:$0xff]  ;;  %v705_v2 = vld [vmem:[%s1032_s3 + $0x30] sm:$0xff]  ;;  %v704_v4 = vld [vmem:[%s1032_s3 + $0x28] sm:$0xff]  ;;  %s1042_s30 = smov (!%p236_p10, %s598_s30), 7  ;;  %vm498_vm0 = vcmask 130048  }
  0x14   : > { %v698_v1 = vld [vmem:[%s1031_s2 + $0x38] sm:$0xff]  ;;  %348 = vmatpush.bf16.msra.mxu0 %v706_v0  ;;  %708 = vmatpush.bf16.msra.mxu2 %v706_v0  ;;  %v697_v3 = vld [vmem:[%s1031_s2 + $0x30] sm:$0xff]  ;;  %v696_v5 = vld [vmem:[%s1031_s2 + $0x28] sm:$0xff]  ;;  %s599_s23 = sshll.u32 %s1042_s30, 2 }
  0x15   : > { %427 = vmatpush.bf16.msra.mxu1 %v698_v1  ;;  %716 = vmatpush.bf16.msra.mxu3 %v698_v1  ;;  %v703_v6 = vld [vmem:[%s1032_s3 + $0x20] sm:$0xff]  ;;  %v702_v8 = vld [vmem:[%s1032_s3 + $0x18] sm:$0xff]  ;;  %v701_v10 = vld [vmem:[%s1032_s3 + $0x10] sm:$0xff]  ;;  %s245_s8 = scalar_lea.vmem %s1030_s1, %s599_s23  ;;  %s239_s30 = scalar_lea.vmem %s1029_s0, %s599_s23 }
  0x16   : > { %v695_v7 = vld [vmem:[%s1031_s2 + $0x20] sm:$0xff]  ;;  %v694_v9 = vld [vmem:[%s1031_s2 + $0x18] sm:$0xff]  ;;  %v693_v11 = vld [vmem:[%s1031_s2 + $0x10] sm:$0xff]  ;;  %s707_s23 = sshll.u32 %s899_s22, 5  ;;  %s504_s22 = scalar_lea.sflag [#allocation3], %s232_s15 }
  0x17   : > { %v700_v12 = vld [vmem:[%s1032_s3 + $0x8] sm:$0xff]  ;;  %v699_v14 = vld [vmem:[%s1032_s3] sm:$0xff]  ;;  %s515_s6 = scalar_lea.hbm %s1034_s5, %s707_s23 }
  0x18   : > { %349 = vmatpush.bf16.msra.mxu0 %v705_v2  ;;  %709 = vmatpush.bf16.msra.mxu2 %v705_v2  ;;  %v692_v13 = vld [vmem:[%s1031_s2 + $0x8] sm:$0xff]  ;;  %v691_v15 = vld [vmem:[%s1031_s2] sm:$0xff] }
  0x19   : > { %428 = vmatpush.bf16.msra.mxu1 %v697_v3  ;;  %717 = vmatpush.bf16.msra.mxu3 %v697_v3  ;;  %v689_v16 = vld [vmem:[%s245_s8] sm:$0xff]  ;;  %v690_v17 = vld [vmem:[%s245_s8 + $0x8] sm:$0xff]  ;;  %s518_s8 = sshll.u32 %s515_s6, 4  ;;  %s519_s8 = int_to_ptr.hbm [resolvable:$true] %s518_s8 }
  0x1a   : > { %v687_v18 = vld [vmem:[%s239_s30] sm:$0xff]  ;;  %v688_v19 = vld [vmem:[%s239_s30 + $0x8] sm:$0xff]  ;;  %s796_s9 = sshra.s32 %s519_s8, 4  ;;  %s802_s30 = scalar_lea.hbm %s1034_s5, 64  ;;  %s797_s9 = int_to_ptr.hbm [resolvable:$true] %s796_s9 }
  0x1b   : > { %v765_v21 = vld [vmem:[%s1033_s4] ss:$0 sm:$0xff]  ;;  %s798_s10 = scalar_lea.hbm %s797_s9, 32  ;;  %p803_p0 = scmp.lt.s32.totalorder %s797_s9, %s1034_s5 }
  0x1c   : > { %350 = vmatpush.bf16.msra.mxu0 %v704_v4  ;;  %710 = vmatpush.bf16.msra.mxu2 %v704_v4  ;;  %p799_p11 = scmp.ne.s32.totalorder %s797_s9, %s798_s10  ;;  %p804_p1 = scmp.lt.s32.totalorder %s802_s30, %s798_s10 }
  0x1d   : > { %429 = vmatpush.bf16.msra.mxu1 %v696_v5  ;;  %718 = vmatpush.bf16.msra.mxu3 %v696_v5 }
  0x1e   : > { %p800_p12 = pnand %p799_p11, %p916_p5  ;;  %p805_p2 = por %p804_p1, %p803_p0 }
  0x20   : > { %351 = vmatpush.bf16.msra.mxu0 %v703_v6  ;;  %711 = vmatpush.bf16.msra.mxu2 %v703_v6  ;;  %p801_p13 = pneg %p800_p12 }
  0x21   : > { %430 = vmatpush.bf16.msra.mxu1 %v695_v7  ;;  %719 = vmatpush.bf16.msra.mxu3 %v695_v7 }
  0x22   : > { %p806_p3 = pnand %p805_p2, %p801_p13 }
  0x24   : > { %352 = vmatpush.bf16.msra.mxu0 %v702_v8  ;;  %712 = vmatpush.bf16.msra.mxu2 %v702_v8 }
  0x25   : > { %431 = vmatpush.bf16.msra.mxu1 %v694_v9  ;;  %720 = vmatpush.bf16.msra.mxu3 %v694_v9 }
  0x28   : > { %353 = vmatpush.bf16.msra.mxu0 %v701_v10  ;;  %713 = vmatpush.bf16.msra.mxu2 %v701_v10 }
  0x29   : > { %432 = vmatpush.bf16.msra.mxu1 %v693_v11  ;;  %721 = vmatpush.bf16.msra.mxu3 %v693_v11 }
  0x2c   : > { %354 = vmatpush.bf16.msra.mxu0 %v700_v12  ;;  %714 = vmatpush.bf16.msra.mxu2 %v700_v12 }
  0x2d   : > { %433 = vmatpush.bf16.msra.mxu1 %v692_v13  ;;  %722 = vmatpush.bf16.msra.mxu3 %v692_v13 }
  0x30   : > { %355 = vmatpush.bf16.msra.mxu0 %v699_v14  ;;  %715 = vmatpush.bf16.msra.mxu2 %v699_v14 }
  0x31   : > { %434 = vmatpush.bf16.msra.mxu1 %v691_v15  ;;  %723 = vmatpush.bf16.msra.mxu3 %v691_v15 }
  0x33   : > { %356 = vmatmul.bf16.vlgmr.msra.gmra.mxu0 %v689_v16  ;;  %361 = vmatmul.bf16.vlgmr.msra.gmra.mxu2 %v690_v17 }
  0x34   : > { %435 = vmatmul.bf16.vlgmr.msra.gmra.mxu1 %v687_v18  ;;  %440 = vmatmul.bf16.vlgmr.msra.gmra.mxu3 %v688_v19 }
  0xb0   : > { %v357_v20 = vpop.f32.mrf.mxu0 }
  0xb1   : > { %v436_v22 = vpop.f32.mrf.mxu1 }
  0xb2   : > { %v437_v23 = vadd.f32 %v436_v22, %v357_v20 }
  0xb4   : > { %v450_v24 = vadd.f32 %v765_v21, %v437_v23 }
  0xb6   : > { %454 = vmax.xlane.f32.xlu0 %v450_v24  ;;  %v362_v25 = vpop.f32.mrf.mxu2 }
  0xb7   : > { %v441_v26 = vpop.f32.mrf.mxu3 }
  0xb8   : > { %v442_v27 = vadd.f32 %v441_v26, %v362_v25  ;;  %v359_v28 = vpop.f32.mrf.mxu0 }
  0xb9   : > { %v438_v29 = vpop.f32.mrf.mxu1 }
  0xba   : > { %v452_v30 = vadd.f32 %v765_v21, %v442_v27  ;;  %v439_v31 = vadd.f32 %v438_v29, %v359_v28 }
  0xbc   : > { %v451_v32 = vadd.f32 %v765_v21, %v439_v31  ;;  %458 = vmax.xlane.f32.xlu1 %v452_v30 }
  0xbe   : > { %456 = vmax.xlane.f32.xlu0 %v451_v32  ;;  %v364_v33 = vpop.f32.mrf.mxu2 }
  0xbf   : > { %v443_v34 = vpop.f32.mrf.mxu3 }
  0xc0   : > { %v444_v35 = vadd.f32 %v443_v34, %v364_v33 }
  0xc2   : > { %v984_v36 = vadd.f32 %v765_v21, %v444_v35 }
  0xc4   : > { %460 = vmax.xlane.f32.xlu1 %v984_v36 }
 0x129   : > { %v455_v37 = vpop.xlane.xlu0 %454 }
 0x12a   : > { %v462_v38 = vsub.f32 %v450_v24, %v455_v37 }
 0x12c   : > { %v466_v39 = vmul.f32 1.442695, %v462_v38 }
 0x12e   : > { %766 = vpow2.f32 %v466_v39 }
 0x12f   : > { %v459_v40 = vpop.xlane.xlu1 %458 }
 0x130   : > { %v464_v41 = vsub.f32 %v452_v30, %v459_v40 }
 0x131   : > { %v457_v42 = vpop.xlane.xlu0 %456 }
 0x132   : > { %v470_v43 = vmul.f32 1.442695, %v464_v41  ;;  %v463_v44 = vsub.f32 %v451_v32, %v457_v42 }
 0x134   : > { %v767_v45 = vpop.eup %766  ;;  %768 = vpow2.f32 %v470_v43  ;;  %v468_v46 = vmul.f32 1.442695, %v463_v44 }
 0x135   : > { %474 = vadd.xlane.f32.xlu2 %v767_v45 }
 0x136   : > { %770 = vpow2.f32 %v468_v46 }
 0x137   : > { %v461_v47 = vpop.xlane.xlu1 %460 }
 0x138   : > { %v465_v48 = vsub.f32 %v984_v36, %v461_v47 }
 0x13a   : > { %v769_v49 = vpop.eup %768  ;;  %v472_v50 = vmul.f32 1.442695, %v465_v48 }
 0x13b   : > { %478 = vadd.xlane.f32.xlu0 %v769_v49 }
 0x13c   : > { %v771_v51 = vpop.eup %770  ;;  %772 = vpow2.f32 %v472_v50 }
 0x13d   : > { %476 = vadd.xlane.f32.xlu2 %v771_v51 }
 0x142   : > { %v773_v52 = vpop.eup %772 }
 0x143   : > { %480 = vadd.xlane.f32.xlu1 %v773_v52 }
 0x1a8   : > { %v475_v53 = vpop.xlane.xlu2 %474 }
 0x1a9   : > { %774 = vlog2.f32 %v475_v53 }
 0x1ae   : > { %v479_v54 = vpop.xlane.xlu0 %478 }
 0x1af   : > { %v775_v55 = vpop.eup %774  ;;  %776 = vlog2.f32 %v479_v54 }
 0x1b0   : > { %v483_v56 = vmul.f32 0.6931472, %v775_v55  ;;  %v477_v57 = vpop.xlane.xlu2 %476 }
 0x1b1   : > { %778 = vlog2.f32 %v477_v57 }
 0x1b2   : > { %v490_v58 = vadd.f32 %v483_v56, %v455_v37 }
 0x1b4   : > { %v494_v59 = vsub.f32 %v450_v24, %v490_v58 }
 0x1b5   : > { %v777_v60 = vpop.eup %776 }
 0x1b6   : > { %499 = vst.msk [vmem:[%s234_s17] sm:$0xff] %vm498_vm0, %v494_v59  ;;  %v487_v61 = vmul.f32 0.6931472, %v777_v60  ;;  %v481_v62 = vpop.xlane.xlu1 %480 }
 0x1b7   : > { %v779_v63 = vpop.eup %778  ;;  %780 = vlog2.f32 %v481_v62 }
 0x1b8   : > { %v492_v0 = vadd.f32 %v487_v61, %v459_v40  ;;  %v485_v1 = vmul.f32 0.6931472, %v779_v63 }
 0x1ba   : > { %v496_v2 = vsub.f32 %v452_v30, %v492_v0  ;;  %v491_v3 = vadd.f32 %v485_v1, %v457_v42 }
 0x1bc   : > { %501 = vst.msk [vmem:[%s234_s17 + $0x10] sm:$0xff] %vm498_vm0, %v496_v2  ;;  %v495_v4 = vsub.f32 %v451_v32, %v491_v3 }
 0x1bd   : > { %v781_v5 = vpop.eup %780 }
 0x1be   : > { %500 = vst.msk [vmem:[%s234_s17 + $0x8] sm:$0xff] %vm498_vm0, %v495_v4  ;;  %v489_v6 = vmul.f32 0.6931472, %v781_v5 }
 0x1c0   : > { %v493_v7 = vadd.f32 %v489_v6, %v461_v47 }
 0x1c2   : > { %v497_v8 = vsub.f32 %v984_v36, %v493_v7 }
 0x1c4   : > { %502 = vst.msk [vmem:[%s234_s17 + $0x18] sm:$0xff] %vm498_vm0, %v497_v8 }
 0x1c5   : > { %809 = shalt.err (!%p806_p3)
}
 0x1c6   : > { %s846_s15 = smov 128   ;;  %s847_s16 = smov 8  }
 0x1c7   : > { %724 = dma.vmem_to_hbm [thread:$0]  (%p916_p5), %s517_s7, 512, %s519_s8, %s504_s22, %s846_s15, %s846_s15, %s847_s16  }
 0x1c8 PF: > { %p730_p4 = scmp.ge.s32.totalorder %s844_s21, 2  ;;  %s533_s17 = sand.u32 1, %s832_s18  }
 0x1c9   : > { %s534_s23 = scalar_lea.sflag [#allocation3], %s533_s17 }
 0x1ca   : > { %p727_p7 = pnand %p730_p4, %p920_p6 }
 0x1cc   : > { %p728_p8 = pneg %p727_p7 }
 0x1ce   : > { %827 = dma.done.wait (%p728_p8), %s534_s23, 512  }
 0x1cf   : > { %829 = vsyncadd (%p728_p8), %s534_s23, 4294966784  ;;  %p15_p9 = scmp.ge.s32.totalorder %s903_s24, 4   ;;  %s1037_s18 = smov %s836_s19 }
 0x1d0   : > { %s1038_s19 = smov %s840_s20  ;;  %s1039_s20 = smov %s914_s27 }
 0x1d1   : > { %s1040_s21 = smov %s903_s24  ;;  %17 = sbr.rel (!%p15_p9) target bundleno = 3 (0x3), region = 78 }
 0x1d6   :  { %540 = vsyncpa [#allocation3], 1 }
 0x1d7   :  { %542 = vsyncpa [#allocation3 + $0x1], 1 }

// kernel: seq2seq_forward.3
= control target key start
LH: loop header
LB: loop body
LE: loop exit
PB: predicated region body
PF: predicated region fallthrough
CT: control target
= control target key end

     0   :  { %s1668_s1 = inlined_call_operand.vmem [shape: bf16[128,384], index: 1, kind: input, shape index: {}]   ;;  %s1669_s2 = inlined_call_operand.vmem [shape: bf16[128,384], index: 2, kind: input, shape index: {}]   ;;  %s1670_s5 = inlined_call_operand.vmem [shape: bf16[128,128], index: 5, kind: input, shape index: {}]   ;;  %s1671_s6 = inlined_call_operand.vmem [shape: bf16[8,8,128], index: 6, kind: output, shape index: {0}]   ;;  %s1672_s7 = inlined_call_operand.vmem [shape: bf16[8,8,128], index: 7, kind: output, shape index: {1}]   ;;  %s1673_s8 = inlined_call_operand.vmem [shape: f32[8,128], index: 8, kind: output, shape index: {2}]   ;;  %s1674_s0 = inlined_call_operand.vmem [shape: bf16[8,8,128], index: 0, kind: input, shape index: {}]   ;;  %s1675_s3 = inlined_call_operand.vmem [shape: f32[1,384], index: 3, kind: input, shape index: {}]   ;;  %s1676_s4 = inlined_call_operand.vmem [shape: f32[1,384], index: 4, kind: input, shape index: {}]  }
   0x1   :  { %v1060_v0 = vld [vmem:[%s1668_s1 + $0xac] sm:$0xf]  ;;  %v879_v1 = vld [vmem:[%s1668_s1 + $0xb4] sm:$0xf0]  ;;  %v885_v2 = vld [vmem:[%s1668_s1 + $0xb0] sm:$0xf] }
   0x2   :  { %v882_v3 = vor.u32 %v1060_v0, %v879_v1  ;;  %v1062_v4 = vld [vmem:[%s1668_s1 + $0xb8] sm:$0xf0]  ;;  %v1057_v5 = vld [vmem:[%s1668_s1 + $0x94] sm:$0xf]  ;;  %v867_v6 = vld [vmem:[%s1668_s1 + $0x9c] sm:$0xf0] }
   0x3   :  { %v886_v7 = vor.u32 %v1062_v4, %v885_v2  ;;  %v873_v8 = vld [vmem:[%s1668_s1 + $0x98] sm:$0xf]  ;;  %v1059_v9 = vld [vmem:[%s1668_s1 + $0xa0] sm:$0xf0]  ;;  %v877_v10 = vld [vmem:[%s1668_s1 + $0xa8] sm:$0xf]  ;;  %v870_v11 = vor.u32 %v1057_v5, %v867_v6 }
   0x4   :  { %255 = vmatpush.bf16.msra.mxu1 %v882_v3  ;;  %v1061_v12 = vld [vmem:[%s1668_s1 + $0xb0] sm:$0xf0]  ;;  %v874_v13 = vor.u32 %v1059_v9, %v873_v8  ;;  %v1054_v15 = vld [vmem:[%s1668_s1 + $0x7c] sm:$0xf]  ;;  %v855_v16 = vld [vmem:[%s1668_s1 + $0x84] sm:$0xf0] }
   0x5   :  { %284 = vmatpush.bf16.msra.mxu2 %v886_v7  ;;  %v878_v14 = vor.u32 %v1061_v12, %v877_v10  ;;  %v865_v17 = vld [vmem:[%s1668_s1 + $0x90] sm:$0xf]  ;;  %v861_v18 = vld [vmem:[%s1668_s1 + $0x80] sm:$0xf]  ;;  %v1056_v19 = vld [vmem:[%s1668_s1 + $0x88] sm:$0xf0]  ;;  %v858_v22 = vor.u32 %v1054_v15, %v855_v16 }
   0x6   :  { %v1058_v20 = vld [vmem:[%s1668_s1 + $0x98] sm:$0xf0]  ;;  %v853_v23 = vld [vmem:[%s1668_s1 + $0x78] sm:$0xf]  ;;  %v1055_v24 = vld [vmem:[%s1668_s1 + $0x80] sm:$0xf0]  ;;  %v862_v25 = vor.u32 %v1056_v19, %v861_v18 }
   0x7   :  { %1123 = vmatpush.bf16.msra.mxu3 %v878_v14  ;;  %v866_v21 = vor.u32 %v1058_v20, %v865_v17  ;;  %226 = vmatpush.bf16.msra.mxu0 %v878_v14  ;;  %v1051_v26 = vld [vmem:[%s1668_s1 + $0x64] sm:$0xf]  ;;  %v843_v27 = vld [vmem:[%s1668_s1 + $0x6c] sm:$0xf0]  ;;  %v849_v28 = vld [vmem:[%s1668_s1 + $0x68] sm:$0xf]  ;;  %v854_v30 = vor.u32 %v1055_v24, %v853_v23 }
   0x8   :  { %256 = vmatpush.bf16.msra.mxu1 %v870_v11  ;;  %v1053_v29 = vld [vmem:[%s1668_s1 + $0x70] sm:$0xf0]  ;;  %v846_v31 = vor.u32 %v1051_v26, %v843_v27  ;;  %v841_v32 = vld [vmem:[%s1668_s1 + $0x60] sm:$0xf]  ;;  %v1052_v33 = vld [vmem:[%s1668_s1 + $0x68] sm:$0xf0] }
   0x9   :  { %285 = vmatpush.bf16.msra.mxu2 %v874_v13  ;;  %v850_v34 = vor.u32 %v1053_v29, %v849_v28  ;;  %v1048_v35 = vld [vmem:[%s1668_s1 + $0x4c] sm:$0xf]  ;;  %v831_v36 = vld [vmem:[%s1668_s1 + $0x54] sm:$0xf0]  ;;  %v837_v37 = vld [vmem:[%s1668_s1 + $0x50] sm:$0xf]  ;;  %v842_v39 = vor.u32 %v1052_v33, %v841_v32 }
   0xa   :  { %v1050_v38 = vld [vmem:[%s1668_s1 + $0x58] sm:$0xf0]  ;;  %v834_v40 = vor.u32 %v1048_v35, %v831_v36  ;;  %v829_v41 = vld [vmem:[%s1668_s1 + $0x48] sm:$0xf]  ;;  %v1049_v42 = vld [vmem:[%s1668_s1 + $0x50] sm:$0xf0] }
   0xb   :  { %1124 = vmatpush.bf16.msra.mxu3 %v866_v21  ;;  %227 = vmatpush.bf16.msra.mxu0 %v866_v21  ;;  %v838_v43 = vor.u32 %v1050_v38, %v837_v37  ;;  %v1045_v44 = vld [vmem:[%s1668_s1 + $0x34] sm:$0xf]  ;;  %v819_v45 = vld [vmem:[%s1668_s1 + $0x3c] sm:$0xf0]  ;;  %v825_v46 = vld [vmem:[%s1668_s1 + $0x38] sm:$0xf]  ;;  %v830_v48 = vor.u32 %v1049_v42, %v829_v41 }
   0xc   :  { %257 = vmatpush.bf16.msra.mxu1 %v858_v22  ;;  %v1047_v47 = vld [vmem:[%s1668_s1 + $0x40] sm:$0xf0]  ;;  %v822_v49 = vor.u32 %v1045_v44, %v819_v45  ;;  %v817_v50 = vld [vmem:[%s1668_s1 + $0x30] sm:$0xf]  ;;  %v1046_v51 = vld [vmem:[%s1668_s1 + $0x38] sm:$0xf0] }
   0xd   :  { %286 = vmatpush.bf16.msra.mxu2 %v862_v25  ;;  %v826_v52 = vor.u32 %v1047_v47, %v825_v46  ;;  %v1042_v53 = vld [vmem:[%s1668_s1 + $0x1c] sm:$0xf]  ;;  %v807_v54 = vld [vmem:[%s1668_s1 + $0x24] sm:$0xf0]  ;;  %v813_v55 = vld [vmem:[%s1668_s1 + $0x20] sm:$0xf]  ;;  %v818_v57 = vor.u32 %v1046_v51, %v817_v50 }
   0xe   :  { %v1044_v56 = vld [vmem:[%s1668_s1 + $0x28] sm:$0xf0]  ;;  %v810_v58 = vor.u32 %v1042_v53, %v807_v54  ;;  %v805_v59 = vld [vmem:[%s1668_s1 + $0x18] sm:$0xf]  ;;  %v1043_v60 = vld [vmem:[%s1668_s1 + $0x20] sm:$0xf0] }
   0xf   :  { %1125 = vmatpush.bf16.msra.mxu3 %v854_v30  ;;  %228 = vmatpush.bf16.msra.mxu0 %v854_v30  ;;  %v814_v61 = vor.u32 %v1044_v56, %v813_v55  ;;  %v1039_v62 = vld [vmem:[%s1668_s1 + $0x4] sm:$0xf]  ;;  %v795_v63 = vld [vmem:[%s1668_s1 + $0xc] sm:$0xf0]  ;;  %v801_v0 = vld [vmem:[%s1668_s1 + $0x8] sm:$0xf]  ;;  %v806_v2 = vor.u32 %v1043_v60, %v805_v59 }
  0x10   :  { %258 = vmatpush.bf16.msra.mxu1 %v846_v31  ;;  %v1041_v1 = vld [vmem:[%s1668_s1 + $0x10] sm:$0xf0]  ;;  %v798_v3 = vor.u32 %v1039_v62, %v795_v63  ;;  %v793_v4 = vld [vmem:[%s1668_s1] sm:$0xf]  ;;  %v1040_v5 = vld [vmem:[%s1668_s1 + $0x8] sm:$0xf0] }
  0x11   :  { %287 = vmatpush.bf16.msra.mxu2 %v850_v34  ;;  %v802_v6 = vor.u32 %v1041_v1, %v801_v0  ;;  %v1035_v7 = vld [vmem:[%s1674_s0] sm:$0xff]  ;;  %v794_v8 = vor.u32 %v1040_v5, %v793_v4  ;;  %v1036_v9 = vld [vmem:[%s1674_s0 + $0x8] sm:$0xff]  ;;  %v1037_v10 = vld [vmem:[%s1674_s0 + $0x10] sm:$0xff]  ;;  %v1439_v4 = vmov 0.0  }
  0x12   :  { %v1038_v11 = vld [vmem:[%s1674_s0 + $0x18] sm:$0xff]  ;;  %v66_v12 = vld [vmem:[%s1675_s3] sm:$0x7] }
  0x13   :  { %1126 = vmatpush.bf16.msra.mxu3 %v842_v39  ;;  %229 = vmatpush.bf16.msra.mxu0 %v842_v39  ;;  %v1401_v13 = vperm.slane %v66_v12, 1  ;;  %v1404_v16 = vperm.slane %v66_v12, 2  ;;  %v1406_v17 = vperm.slane %v66_v12, 0  ;;  %v1424_v45 = vld [vmem:[%s1676_s4] sm:$0x7]  ;;  %s1441_s4 = smov 0  }
  0x14   :  { %259 = vmatpush.bf16.msra.mxu1 %v834_v40  ;;  %v339_v47 = vperm.slane %v1424_v45, 0 }
  0x15   :  { %288 = vmatpush.bf16.msra.mxu2 %v838_v43 }
  0x17   :  { %1127 = vmatpush.bf16.msra.mxu3 %v830_v48  ;;  %230 = vmatpush.bf16.msra.mxu0 %v830_v48  ;;  %v340_v48 = vperm.slane %v1424_v45, 1 }
  0x18   :  { %260 = vmatpush.bf16.msra.mxu1 %v822_v49  ;;  %v341_v49 = vperm.slane %v1424_v45, 2 }
  0x19   :  { %289 = vmatpush.bf16.msra.mxu2 %v826_v52 }
  0x1b   :  { %1128 = vmatpush.bf16.msra.mxu3 %v818_v57  ;;  %231 = vmatpush.bf16.msra.mxu0 %v818_v57 }
  0x1c   :  { %261 = vmatpush.bf16.msra.mxu1 %v810_v58 }
  0x1d   :  { %290 = vmatpush.bf16.msra.mxu2 %v814_v61 }
  0x1f   :  { %1129 = vmatpush.bf16.msra.mxu3 %v806_v2  ;;  %232 = vmatpush.bf16.msra.mxu0 %v806_v2 }
  0x20   :  { %262 = vmatpush.bf16.msra.mxu1 %v798_v3 }
  0x21   :  { %291 = vmatpush.bf16.msra.mxu2 %v802_v6 }
  0x23   :  { %263 = vmatmul.bf16.vlgmr.msra.gmra.mxu1 %v1035_v7  ;;  %1130 = vmatpush.bf16.msra.mxu3 %v794_v8 }
  0x24   :  { %292 = vmatmul.bf16.vlgmr.msra.gmra.mxu2 %v1035_v7  ;;  %233 = vmatpush.bf16.msra.mxu0 %v794_v8 }
  0x26   :  { %239 = vmatmul.bf16.vlgmr.msra.gmra.mxu3 %v1036_v9 }
  0x27   :  { %234 = vmatmul.bf16.vlgmr.msra.gmra.mxu0 %v1035_v7 }
  0x33   :  { %268 = vmatmul.bf16.gmra.mxu1 %v1036_v9 }
  0x34   :  { %297 = vmatmul.bf16.gmra.mxu2 %v1036_v9 }
  0x36   :  { %244 = vmatmul.bf16.gmra.mxu3 %v1037_v10 }
  0x43   :  { %273 = vmatmul.bf16.gmra.mxu1 %v1037_v10 }
  0x44   :  { %302 = vmatmul.bf16.gmra.mxu2 %v1037_v10 }
  0x46   :  { %249 = vmatmul.bf16.gmra.mxu3 %v1038_v11 }
  0x53   :  { %278 = vmatmul.bf16.gmra.mxu1 %v1038_v11 }
  0x54   :  { %307 = vmatmul.bf16.gmra.mxu2 %v1038_v11 }
  0xa0   :  { %v264_v14 = vpop.f32.mrf.mxu1 }
  0xa1   :  { %v265_v15 = vadd.f32 %v264_v14, %v1401_v13 }
  0xa3   :  { %314 = vst [vmem:[#allocation2 + $0x8] sm:$0xff] %v265_v15 }
  0xa4   :  { %v235_v24 = vpop.f32.mrf.mxu0 }
  0xa5   :  { %v236_v25 = vadd.f32 %v235_v24, %v1406_v17 }
  0xa7   :  { %v293_v18 = vpop.f32.mrf.mxu2  ;;  %313 = vst [vmem:[#allocation2] sm:$0xff] %v236_v25 }
  0xa8   :  { %v294_v19 = vadd.f32 %v293_v18, %v1404_v16  ;;  %v266_v20 = vpop.f32.mrf.mxu1 }
  0xa9   :  { %v267_v21 = vadd.f32 %v266_v20, %v1401_v13  ;;  %v240_v22 = vpop.f32.mrf.mxu3 }
  0xaa   :  { %315 = vst [vmem:[#allocation2 + $0x10] sm:$0xff] %v294_v19  ;;  %v241_v23 = vadd.f32 %v240_v22, %v1406_v17 }
  0xab   :  { %317 = vst [vmem:[#allocation2 + $0x20] sm:$0xff] %v267_v21 }
  0xac   :  { %319 = vst [vmem:[#allocation2 + $0x30] sm:$0xff] %v241_v23  ;;  %v237_v32 = vpop.f32.mrf.mxu0 }
  0xad   :  { %v238_v33 = vadd.f32 %v237_v32, %v1406_v17 }
  0xaf   :  { %v295_v26 = vpop.f32.mrf.mxu2  ;;  %316 = vst [vmem:[#allocation2 + $0x18] sm:$0xff] %v238_v33 }
  0xb0   :  { %v296_v27 = vadd.f32 %v295_v26, %v1404_v16  ;;  %v269_v28 = vpop.f32.mrf.mxu1 }
  0xb1   :  { %v270_v29 = vadd.f32 %v269_v28, %v1401_v13  ;;  %v242_v30 = vpop.f32.mrf.mxu3 }
  0xb2   :  { %318 = vst [vmem:[#allocation2 + $0x28] sm:$0xff] %v296_v27  ;;  %v243_v31 = vadd.f32 %v242_v30, %v1406_v17 }
  0xb3   :  { %320 = vst [vmem:[#allocation2 + $0x38] sm:$0xff] %v270_v29 }
  0xb4   :  { %322 = vst [vmem:[#allocation2 + $0x48] sm:$0xff] %v243_v31 }
  0xb7   :  { %v298_v34 = vpop.f32.mrf.mxu2 }
  0xb8   :  { %v299_v35 = vadd.f32 %v298_v34, %v1404_v16  ;;  %v271_v36 = vpop.f32.mrf.mxu1 }
  0xb9   :  { %v272_v37 = vadd.f32 %v271_v36, %v1401_v13  ;;  %v245_v38 = vpop.f32.mrf.mxu3 }
  0xba   :  { %321 = vst [vmem:[#allocation2 + $0x40] sm:$0xff] %v299_v35  ;;  %v246_v39 = vadd.f32 %v245_v38, %v1406_v17 }
  0xbb   :  { %323 = vst [vmem:[#allocation2 + $0x50] sm:$0xff] %v272_v37 }
  0xbc   :  { %325 = vst [vmem:[#allocation2 + $0x60] sm:$0xff] %v246_v39 }
  0xbf   :  { %v300_v40 = vpop.f32.mrf.mxu2 }
  0xc0   :  { %v301_v41 = vadd.f32 %v300_v40, %v1404_v16  ;;  %v274_v42 = vpop.f32.mrf.mxu1 }
  0xc1   :  { %v275_v43 = vadd.f32 %v274_v42, %v1401_v13  ;;  %v247_v44 = vpop.f32.mrf.mxu3 }
  0xc2   :  { %324 = vst [vmem:[#allocation2 + $0x58] sm:$0xff] %v301_v41  ;;  %v248_v46 = vadd.f32 %v247_v44, %v1406_v17 }
  0xc3   :  { %326 = vst [vmem:[#allocation2 + $0x68] sm:$0xff] %v275_v43 }
  0xc4   :  { %328 = vst [vmem:[#allocation2 + $0x78] sm:$0xff] %v248_v46 }
  0xc7   :  { %v303_v50 = vpop.f32.mrf.mxu2 }
  0xc8   :  { %v304_v51 = vadd.f32 %v303_v50, %v1404_v16  ;;  %v276_v52 = vpop.f32.mrf.mxu1 }
  0xc9   :  { %v277_v53 = vadd.f32 %v276_v52, %v1401_v13  ;;  %v250_v54 = vpop.f32.mrf.mxu3 }
  0xca   :  { %327 = vst [vmem:[#allocation2 + $0x70] sm:$0xff] %v304_v51  ;;  %v251_v55 = vadd.f32 %v250_v54, %v1406_v17 }
  0xcb   :  { %329 = vst [vmem:[#allocation2 + $0x80] sm:$0xff] %v277_v53 }
  0xcc   :  { %331 = vst [vmem:[#allocation2 + $0x90] sm:$0xff] %v251_v55 }
  0xcf   :  { %v305_v56 = vpop.f32.mrf.mxu2 }
  0xd0   :  { %v306_v57 = vadd.f32 %v305_v56, %v1404_v16  ;;  %v279_v58 = vpop.f32.mrf.mxu1 }
  0xd1   :  { %v280_v59 = vadd.f32 %v279_v58, %v1401_v13  ;;  %v252_v60 = vpop.f32.mrf.mxu3 }
  0xd2   :  { %330 = vst [vmem:[#allocation2 + $0x88] sm:$0xff] %v306_v57  ;;  %v253_v61 = vadd.f32 %v252_v60, %v1406_v17 }
  0xd3   :  { %332 = vst [vmem:[#allocation2 + $0x98] sm:$0xff] %v280_v59 }
  0xd4   :  { %334 = vst [vmem:[#allocation2 + $0xa8] sm:$0xff] %v253_v61 }
  0xd7   :  { %v308_v62 = vpop.f32.mrf.mxu2 }
  0xd8   :  { %v309_v63 = vadd.f32 %v308_v62, %v1404_v16  ;;  %v281_v0 = vpop.f32.mrf.mxu1 }
  0xd9   :  { %v282_v1 = vadd.f32 %v281_v0, %v1401_v13 }
  0xda   :  { %333 = vst [vmem:[#allocation2 + $0xa0] sm:$0xff] %v309_v63 }
  0xdb   :  { %335 = vst [vmem:[#allocation2 + $0xb0] sm:$0xff] %v282_v1 }
  0xdf   :  { %v310_v2 = vpop.f32.mrf.mxu2 }
  0xe0   :  { %v311_v3 = vadd.f32 %v310_v2, %v1404_v16 }
  0xe2   :  { %336 = vst [vmem:[#allocation2 + $0xb8] sm:$0xff] %v311_v3 }
  0xe3 LB: > { %v974_v5 = vld [vmem:[%s1669_s2 + $0xa8] sm:$0xf]  ;;  %v1086_v6 = vld [vmem:[%s1669_s2 + $0xb0] sm:$0xf0]  ;;  %v1085_v7 = vld [vmem:[%s1669_s2 + $0xac] sm:$0xf]  ;;  %s1195_s4 = sphi %s1441_s4, %s350_s4   ;;  %v1191_v4 = vphi %v1439_v4, %v1677_v4  }
  0xe4   : > { %v975_v8 = vor.u32 %v1086_v6, %v974_v5  ;;  %v976_v9 = vld [vmem:[%s1669_s2 + $0xb4] sm:$0xf0]  ;;  %v962_v10 = vld [vmem:[%s1669_s2 + $0x90] sm:$0xf]  ;;  %v1083_v11 = vld [vmem:[%s1669_s2 + $0x98] sm:$0xf0] }
  0xe5   : > { %v979_v12 = vor.u32 %v1085_v7, %v976_v9  ;;  %v1082_v13 = vld [vmem:[%s1669_s2 + $0x94] sm:$0xf]  ;;  %v964_v14 = vld [vmem:[%s1669_s2 + $0x9c] sm:$0xf0]  ;;  %v963_v15 = vor.u32 %v1083_v11, %v962_v10  ;;  %v950_v17 = vld [vmem:[%s1669_s2 + $0x78] sm:$0xf] }
  0xe6   : > { %519 = vmatpush.bf16.msra.mxu0 %v975_v8  ;;  %v967_v16 = vor.u32 %v1082_v13, %v964_v14  ;;  %v1080_v18 = vld [vmem:[%s1669_s2 + $0x80] sm:$0xf0]  ;;  %v1079_v19 = vld [vmem:[%s1669_s2 + $0x7c] sm:$0xf]  ;;  %v952_v20 = vld [vmem:[%s1669_s2 + $0x84] sm:$0xf0]  ;;  %v358_v14 = vpack.c.bf16 %v1191_v4, %v1191_v4 }
  0xe7   : > { %532 = vmatpush.bf16.msra.mxu1 %v979_v12  ;;  %v982_v21 = vld [vmem:[%s1669_s2 + $0xb0] sm:$0xf]  ;;  %v951_v22 = vor.u32 %v1080_v18, %v950_v17  ;;  %v1087_v23 = vld [vmem:[%s1669_s2 + $0xb8] sm:$0xf0]  ;;  %v955_v24 = vor.u32 %v1079_v19, %v952_v20  ;;  %v938_v25 = vld [vmem:[%s1669_s2 + $0x60] sm:$0xf] }
  0xe8   : > { %v1077_v26 = vld [vmem:[%s1669_s2 + $0x68] sm:$0xf0]  ;;  %v983_v27 = vor.u32 %v1087_v23, %v982_v21  ;;  %v970_v28 = vld [vmem:[%s1669_s2 + $0x98] sm:$0xf]  ;;  %v1076_v29 = vld [vmem:[%s1669_s2 + $0x64] sm:$0xf] }
  0xe9   : > { %v940_v30 = vld [vmem:[%s1669_s2 + $0x6c] sm:$0xf0]  ;;  %v1084_v31 = vld [vmem:[%s1669_s2 + $0xa0] sm:$0xf0]  ;;  %v939_v33 = vor.u32 %v1077_v26, %v938_v25  ;;  %v958_v34 = vld [vmem:[%s1669_s2 + $0x80] sm:$0xf] }
  0xea   : > { %520 = vmatpush.bf16.msra.mxu0 %v963_v15  ;;  %545 = vmatpush.bf16.msra.mxu2 %v983_v27  ;;  %v971_v32 = vor.u32 %v1084_v31, %v970_v28  ;;  %v1081_v35 = vld [vmem:[%s1669_s2 + $0x88] sm:$0xf0]  ;;  %v943_v36 = vor.u32 %v1076_v29, %v940_v30  ;;  %v926_v37 = vld [vmem:[%s1669_s2 + $0x48] sm:$0xf]  ;;  %v1074_v38 = vld [vmem:[%s1669_s2 + $0x50] sm:$0xf0] }
  0xeb   : > { %533 = vmatpush.bf16.msra.mxu1 %v967_v16  ;;  %v1073_v39 = vld [vmem:[%s1669_s2 + $0x4c] sm:$0xf]  ;;  %v928_v40 = vld [vmem:[%s1669_s2 + $0x54] sm:$0xf0]  ;;  %v959_v41 = vor.u32 %v1081_v35, %v958_v34  ;;  %v927_v42 = vor.u32 %v1074_v38, %v926_v37  ;;  %v946_v43 = vld [vmem:[%s1669_s2 + $0x68] sm:$0xf] }
  0xec   : > { %v1078_v44 = vld [vmem:[%s1669_s2 + $0x70] sm:$0xf0]  ;;  %v931_v46 = vor.u32 %v1073_v39, %v928_v40  ;;  %v914_v50 = vld [vmem:[%s1669_s2 + $0x30] sm:$0xf]  ;;  %v1071_v51 = vld [vmem:[%s1669_s2 + $0x38] sm:$0xf0] }
  0xed   : > { %v1070_v52 = vld [vmem:[%s1669_s2 + $0x34] sm:$0xf]  ;;  %v916_v53 = vld [vmem:[%s1669_s2 + $0x3c] sm:$0xf0]  ;;  %v947_v54 = vor.u32 %v1078_v44, %v946_v43  ;;  %v915_v55 = vor.u32 %v1071_v51, %v914_v50  ;;  %v934_v56 = vld [vmem:[%s1669_s2 + $0x50] sm:$0xf] }
  0xee   : > { %521 = vmatpush.bf16.msra.mxu0 %v951_v22  ;;  %546 = vmatpush.bf16.msra.mxu2 %v971_v32  ;;  %v1075_v57 = vld [vmem:[%s1669_s2 + $0x58] sm:$0xf0]  ;;  %v919_v58 = vor.u32 %v1070_v52, %v916_v53  ;;  %v902_v59 = vld [vmem:[%s1669_s2 + $0x18] sm:$0xf]  ;;  %v1068_v60 = vld [vmem:[%s1669_s2 + $0x20] sm:$0xf0] }
  0xef   : > { %534 = vmatpush.bf16.msra.mxu1 %v955_v24  ;;  %v1067_v61 = vld [vmem:[%s1669_s2 + $0x1c] sm:$0xf]  ;;  %v904_v62 = vld [vmem:[%s1669_s2 + $0x24] sm:$0xf0]  ;;  %v935_v63 = vor.u32 %v1075_v57, %v934_v56  ;;  %v903_v0 = vor.u32 %v1068_v60, %v902_v59  ;;  %v922_v1 = vld [vmem:[%s1669_s2 + $0x38] sm:$0xf] }
  0xf0   : > { %v1072_v2 = vld [vmem:[%s1669_s2 + $0x40] sm:$0xf0]  ;;  %v907_v3 = vor.u32 %v1067_v61, %v904_v62  ;;  %v890_v5 = vld [vmem:[%s1669_s2] sm:$0xf]  ;;  %v1065_v6 = vld [vmem:[%s1669_s2 + $0x8] sm:$0xf0] }
  0xf1   : > { %v1064_v7 = vld [vmem:[%s1669_s2 + $0x4] sm:$0xf]  ;;  %v892_v8 = vld [vmem:[%s1669_s2 + $0xc] sm:$0xf0]  ;;  %v923_v9 = vor.u32 %v1072_v2, %v922_v1  ;;  %v891_v10 = vor.u32 %v1065_v6, %v890_v5  ;;  %v910_v11 = vld [vmem:[%s1669_s2 + $0x20] sm:$0xf] }
  0xf2   : > { %522 = vmatpush.bf16.msra.mxu0 %v939_v33  ;;  %547 = vmatpush.bf16.msra.mxu2 %v959_v41  ;;  %v1069_v12 = vld [vmem:[%s1669_s2 + $0x28] sm:$0xf0]  ;;  %v895_v13 = vor.u32 %v1064_v7, %v892_v8  ;;  %v898_v16 = vld [vmem:[%s1669_s2 + $0x8] sm:$0xf]  ;;  %v1066_v17 = vld [vmem:[%s1669_s2 + $0x10] sm:$0xf0] }
  0xf3   : > { %535 = vmatpush.bf16.msra.mxu1 %v943_v36  ;;  %v911_v15 = vor.u32 %v1069_v12, %v910_v11  ;;  %v899_v18 = vor.u32 %v1066_v17, %v898_v16  ;;  %s1063_s20 = smul.u32 24, %s1195_s4  ;;  %s986_s0 = sshll.u32 %s1195_s4, 2 }
  0xf4   : > { %s607_s23 = scalar_lea.vmem %s1671_s6, %s986_s0  ;;  %s350_s4 = sadd.s32 1, %s1195_s4  }
  0xf5   : > { %s1596_s21 = scalar_lea.vmem [#allocation2], %s1063_s20  ;;  %p347_p0 = scmp.ge.s32.totalorder %s350_s4, 8  }
  0xf6   : > { %523 = vmatpush.bf16.msra.mxu0 %v927_v42  ;;  %548 = vmatpush.bf16.msra.mxu2 %v947_v54  ;;  %v355_v19 = vld [vmem:[%s1596_s21] sm:$0xff]  ;;  %v356_v22 = vld [vmem:[%s1596_s21 + $0x8] sm:$0xff]  ;;  %v1098_v8 = vld [vmem:[%s1670_s5 + $0x30] sm:$0xff] (%p347_p0) }
  0xf7   : > { %536 = vmatpush.bf16.msra.mxu1 %v931_v46  ;;  %v1097_v45 = vld [vmem:[%s1670_s5 + $0x28] sm:$0xff] (%p347_p0) }
  0xfa   : > { %524 = vmatpush.bf16.msra.mxu0 %v915_v55  ;;  %549 = vmatpush.bf16.msra.mxu2 %v935_v63  ;;  %v357_v55 = vld [vmem:[%s1596_s21 + $0x10] sm:$0xff] }
  0xfb   : > { %537 = vmatpush.bf16.msra.mxu1 %v919_v58 }
  0xfe   : > { %525 = vmatpush.bf16.msra.mxu0 %v903_v0  ;;  %550 = vmatpush.bf16.msra.mxu2 %v923_v9  ;;  %v1093_v9 = vld [vmem:[%s1670_s5 + $0x8] sm:$0xff] (%p347_p0) }
  0xff   : > { %538 = vmatpush.bf16.msra.mxu1 %v907_v3 }
 0x102   : > { %526 = vmatpush.bf16.msra.mxu0 %v891_v10  ;;  %551 = vmatpush.bf16.msra.mxu2 %v911_v15  ;;  %v1092_v10 = vld [vmem:[%s1670_s5] sm:$0xff] (%p347_p0) }
 0x103   : > { %539 = vmatpush.bf16.msra.mxu1 %v895_v13 }
 0x105   : > { %527 = vmatmul.bf16.vlgmr.msra.gmra.mxu0 %v358_v14 }
 0x106   : > { %540 = vmatmul.bf16.vlgmr.msra.gmra.mxu1 %v358_v14  ;;  %552 = vmatpush.bf16.msra.mxu2 %v899_v18 }
 0x109   : > { %553 = vmatmul.bf16.vlgmr.msra.gmra.mxu2 %v358_v14 }
 0x182   : > { %v528_v20 = vpop.f32.mrf.mxu0 }
 0x183   : > { %v529_v21 = vadd.f32 %v528_v20, %v339_v47  ;;  %v541_v23 = vpop.f32.mrf.mxu1  ;;  %v1096_v47 = vld [vmem:[%s1670_s5 + $0x20] sm:$0xff] (%p347_p0) }
 0x184   : > { %v542_v24 = vadd.f32 %v541_v23, %v340_v48  ;;  %v1095_v48 = vld [vmem:[%s1670_s5 + $0x18] sm:$0xff] (%p347_p0) }
 0x185   : > { %v558_v25 = vadd.f32 %v529_v21, %v355_v19 }
 0x186   : > { %v578_v26 = vadd.f32 %v542_v24, %v356_v22 }
 0x187   : > { %v984_v27 = vmul.f32 -1.442695, %v558_v25 }
 0x188   : > { %v985_v28 = vmul.f32 -1.442695, %v578_v26 }
 0x189   : > { %1171 = vpow2.f32 %v984_v27 }
 0x18a   : > { %1173 = vpow2.f32 %v985_v28  ;;  %v530_v29 = vpop.f32.mrf.mxu0 }
 0x18b   : > { %v543_v30 = vpop.f32.mrf.mxu1 }
 0x18c   : > { %v554_v32 = vpop.f32.mrf.mxu2 }
 0x18d   : > { %v555_v51 = vadd.f32 %v554_v32, %v341_v49  ;;  %v1094_v49 = vld [vmem:[%s1670_s5 + $0x10] sm:$0xff] (%p347_p0) }
 0x18f   : > { %v1172_v31 = vpop.eup %1171 }
 0x190   : > { %v1174_v33 = vpop.eup %1173  ;;  %v562_v34 = vadd.f32 1.0, %v1172_v31 }
 0x191   : > { %v582_v35 = vadd.f32 1.0, %v1174_v33 }
 0x192   : > { %1175 = vrcp.f32 %v562_v34  ;;  %v574_v43 = vand.u32 2147483648, %v562_v34  ;;  %v572_v46 = vand.u32 2147483647, %v562_v34  ;;  %vm568_vm1 = vweird.f32 %v562_v34 }
 0x193   : > { %1177 = vrcp.f32 %v582_v35  ;;  %vm588_vm4 = vweird.f32 %v582_v35  ;;  %v594_v58 = vand.u32 2147483648, %v582_v35  ;;  %v592_v60 = vand.u32 2147483647, %v582_v35 }
 0x194   : > { %v556_v36 = vpop.f32.mrf.mxu2  ;;  %v575_v53 = vor.u32 1.1754944e-38, %v574_v43  ;;  %vm573_vm3 = vcmp.eq.f32.partialorder %v572_v46, 8.507059e+37 }
 0x195   : > { %v595_v63 = vor.u32 1.1754944e-38, %v594_v58  ;;  %vm593_vm7 = vcmp.eq.f32.partialorder %v592_v60, 8.507059e+37 }
 0x198   : > { %v1176_v37 = vpop.eup %1175 }
 0x199   : > { %v1178_v38 = vpop.eup %1177  ;;  %v564_v39 = vmul.f32 %v1176_v37, %v562_v34  ;;  %vm569_vm0 = vweird.f32 %v1176_v37 }
 0x19a   : > { %v584_v40 = vmul.f32 %v1178_v38, %v582_v35  ;;  %vm570_vm2 = vmor %vm568_vm1, %vm569_vm0  ;;  %vm589_vm5 = vweird.f32 %v1178_v38 }
 0x19b   : > { %v565_v41 = vsub.f32 1.0, %v564_v39  ;;  %vm590_vm6 = vmor %vm588_vm4, %vm589_vm5 }
 0x19c   : > { %v585_v42 = vsub.f32 1.0, %v584_v40 }
 0x19d   : > { %v566_v44 = vmul.f32 %v1176_v37, %v565_v41 }
 0x19e   : > { %v586_v50 = vmul.f32 %v1178_v38, %v585_v42 }
 0x19f   : > { %v567_v52 = vadd.f32 %v1176_v37, %v566_v44 }
 0x1a0   : > { %v587_v57 = vadd.f32 %v1178_v38, %v586_v50 }
 0x1a1   : > { %v571_v54 = vsel %vm570_vm2, %v1176_v37, %v567_v52 }
 0x1a2   : > { %v576_v56 = vsel %vm573_vm3, %v575_v53, %v571_v54  ;;  %v591_v62 = vsel %vm590_vm6, %v1178_v38, %v587_v57 }
 0x1a3   : > { %v598_v59 = vmul.f32 %v576_v56, %v555_v51  ;;  %v596_v0 = vsel %vm593_vm7, %v595_v63, %v591_v62 }
 0x1a4   : > { %v601_v1 = vsub.f32 1.0, %v596_v0  ;;  %v603_v5 = vmul.f32 %v1191_v4, %v596_v0 }
 0x1a5   : > { %v599_v61 = vadd.f32 %v598_v59, %v357_v55 }
 0x1a7   : > { %1179 = vtanh.f32 %v599_v61 }
 0x1ad   : > { %v1180_v2 = vpop.eup %1179 }
 0x1ae   : > { %v602_v3 = vmul.f32 %v1180_v2, %v601_v1 }
 0x1b0   : > { %v604_v6 = vadd.f32 %v603_v5, %v602_v3   ;;  %349 = sbr.rel (!%p347_p0) target bundleno = 227 (0xe3), region = 69 }
 0x1b2   : > { %v605_v7 = vpack.c.bf16 %v604_v6, %v604_v6  ;;  %v1677_v4 = vmov %v604_v6  ;;  %609 = vst [vmem:[%s1673_s8] sm:$0xff] (%p347_p0), %v604_v6 }
 0x1b3   :  { %v1099_v4 = vld [vmem:[%s1670_s5 + $0x38] sm:$0xff] (%p347_p0) }
 0x1b4   : > { %608 = vst [vmem:[%s607_s23] sm:$0xf] %v605_v7  ;;  %706 = vmatpush.bf16.msra.mxu0 (%p347_p0), %v1099_v4  ;;  %1131 = vmatpush.bf16.msra.mxu1 (%p347_p0), %v1099_v4 }
 0x1b5   :  { %1132 = vmatpush.bf16.msra.mxu2 %v1099_v4  ;;  %1133 = vmatpush.bf16.msra.mxu3 %v1099_v4 }
 0x1b8   :  { %707 = vmatpush.bf16.msra.mxu0 %v1098_v8  ;;  %1134 = vmatpush.bf16.msra.mxu1 %v1098_v8 }
 0x1b9   :  { %1135 = vmatpush.bf16.msra.mxu2 %v1098_v8  ;;  %1136 = vmatpush.bf16.msra.mxu3 %v1098_v8 }
 0x1bb   :  { %v1088_v11 = vld [vmem:[%s1671_s6] sm:$0xff]  ;;  %v1089_v12 = vld [vmem:[%s1671_s6 + $0x8] sm:$0xff]  ;;  %v1090_v13 = vld [vmem:[%s1671_s6 + $0x10] sm:$0xff] }
 0x1bc   :  { %708 = vmatpush.bf16.msra.mxu0 %v1097_v45  ;;  %1137 = vmatpush.bf16.msra.mxu1 %v1097_v45  ;;  %v1091_v14 = vld [vmem:[%s1671_s6 + $0x18] sm:$0xff] }
 0x1bd   :  { %1138 = vmatpush.bf16.msra.mxu2 %v1097_v45  ;;  %1139 = vmatpush.bf16.msra.mxu3 %v1097_v45 }
 0x1c0   :  { %709 = vmatpush.bf16.msra.mxu0 %v1096_v47  ;;  %1140 = vmatpush.bf16.msra.mxu1 %v1096_v47 }
 0x1c1   :  { %1141 = vmatpush.bf16.msra.mxu2 %v1096_v47  ;;  %1142 = vmatpush.bf16.msra.mxu3 %v1096_v47 }
 0x1c4   :  { %710 = vmatpush.bf16.msra.mxu0 %v1095_v48  ;;  %1143 = vmatpush.bf16.msra.mxu1 %v1095_v48 }
 0x1c5   :  { %1144 = vmatpush.bf16.msra.mxu2 %v1095_v48  ;;  %1145 = vmatpush.bf16.msra.mxu3 %v1095_v48 }
 0x1c8   :  { %711 = vmatpush.bf16.msra.mxu0 %v1094_v49  ;;  %1146 = vmatpush.bf16.msra.mxu1 %v1094_v49 }
 0x1c9   :  { %1147 = vmatpush.bf16.msra.mxu2 %v1094_v49  ;;  %1148 = vmatpush.bf16.msra.mxu3 %v1094_v49 }
 0x1cc   :  { %712 = vmatpush.bf16.msra.mxu0 %v1093_v9  ;;  %1149 = vmatpush.bf16.msra.mxu1 %v1093_v9 }
 0x1cd   :  { %1150 = vmatpush.bf16.msra.mxu2 %v1093_v9  ;;  %1151 = vmatpush.bf16.msra.mxu3 %v1093_v9 }
 0x1d0   :  { %713 = vmatpush.bf16.msra.mxu0 %v1092_v10  ;;  %1152 = vmatpush.bf16.msra.mxu1 %v1092_v10 }
 0x1d1   :  { %1153 = vmatpush.bf16.msra.mxu2 %v1092_v10  ;;  %1154 = vmatpush.bf16.msra.mxu3 %v1092_v10 }
 0x1d3   :  { %714 = vmatmul.bf16.vlgmr.msra.gmra.mxu0 %v1088_v11  ;;  %719 = vmatmul.bf16.vlgmr.msra.gmra.mxu1 %v1089_v12 }
 0x1d4   :  { %724 = vmatmul.bf16.vlgmr.msra.gmra.mxu2 %v1090_v13  ;;  %729 = vmatmul.bf16.vlgmr.msra.gmra.mxu3 %v1091_v14 }
 0x250   :  { %v715_v15 = vpop.f32.mrf.mxu0  ;;  %v720_v16 = vpop.f32.mrf.mxu1 }
 0x257   :  { %v725_v17 = vpop.f32.mrf.mxu2  ;;  %v730_v18 = vpop.f32.mrf.mxu3 }
 0x258   :  { %v717_v19 = vpop.f32.mrf.mxu0  ;;  %v722_v20 = vpop.f32.mrf.mxu1 }
 0x259   :  { %v1103_v21 = vpack.c.bf16 %v717_v19, %v715_v15  ;;  %v1108_v22 = vpack.c.bf16 %v722_v20, %v720_v16 }
 0x25b   :  { %1104 = vst [vmem:[%s1672_s7] sm:$0xff] %v1103_v21  }
 0x25c   :  { %1120 = vst [vmem:[%s1672_s7 + $0x8] sm:$0xff] %v1108_v22  }
 0x25f   :  { %v727_v23 = vpop.f32.mrf.mxu2  ;;  %v732_v24 = vpop.f32.mrf.mxu3 }
 0x260   :  { %v1113_v25 = vpack.c.bf16 %v727_v23, %v725_v17  ;;  %v1118_v26 = vpack.c.bf16 %v732_v24, %v730_v18 }
 0x262   :  { %1121 = vst [vmem:[%s1672_s7 + $0x10] sm:$0xff] %v1113_v25  }
 0x263   :  { %1122 = vst [vmem:[%s1672_s7 + $0x18] sm:$0xff] %v1118_v26  }

// kernel: seq2seq_forward.4
= control target key start
LH: loop header
LB: loop body
LE: loop exit
PB: predicated region body
PF: predicated region fallthrough
CT: control target
= control target key end

     0   :  { %17 = vsyncpa [#allocation4], 0  ;;  %s2121_s0 = inlined_call_operand.vmem [shape: bf16[8,8,128], index: 0, kind: input, shape index: {}]   ;;  %s2122_s1 = inlined_call_operand.vmem [shape: f32[8,128], index: 1, kind: input, shape index: {}]   ;;  %s2123_s2 = inlined_call_operand.vmem [shape: bf16[8,8,128], index: 2, kind: input, shape index: {}]   ;;  %s2124_s3 = inlined_call_operand.vmem [shape: bf16[8,8,128], index: 3, kind: input, shape index: {}]   ;;  %s2125_s4 = inlined_call_operand.vmem [shape: bf16[128,512], index: 4, kind: input, shape index: {}]   ;;  %s2126_s5 = inlined_call_operand.vmem [shape: f32[1,512], index: 5, kind: input, shape index: {}]   ;;  %s2127_s6 = inlined_call_operand.vmem [shape: f32[1,128], index: 6, kind: input, shape index: {}]   ;;  %s2128_s7 = inlined_call_operand.hbm [shape: bf16[128,384], index: 7, kind: input, shape index: {}]   ;;  %s2129_s8 = inlined_call_operand.hbm [shape: bf16[128,384], index: 8, kind: input, shape index: {}]   ;;  %s2130_s9 = inlined_call_operand.vmem [shape: f32[1,384], index: 9, kind: input, shape index: {}]   ;;  %s2131_s10 = inlined_call_operand.vmem [shape: bf16[8,8,128], index: 10, kind: output, shape index: {0}]   ;;  %s2132_s11 = inlined_call_operand.vmem [shape: bf16[8,8,128], index: 11, kind: output, shape index: {1}]  }
   0x1   :  { %s37_s19 = sshll.u32 %s2128_s7, 4  ;;  %s38_s19 = int_to_ptr.hbm [resolvable:$true] %s37_s19 }
   0x2   :  { %18 = vsyncpa [#allocation6], 0  ;;  %s1672_s20 = smov [#allocation3]   ;;  %s50_s24 = sshll.u32 %s2129_s8, 4  ;;  %s51_s24 = int_to_ptr.hbm [resolvable:$true] %s50_s24 }
   0x3   :  { %s39_s21 = sshll.u32 %s1672_s20, 4  ;;  %s1673_s25 = smov 192   ;;  %s40_s21 = int_to_ptr.vmem [resolvable:$true] %s39_s21 }
   0x4   :  { %s1674_s26 = smov 12   ;;  %s1675_s27 = smov [#allocation5]  }
   0x5   :  { %45 = dma.hbm_to_vmem [thread:$0]  %s38_s19, 3072, %s40_s21, [#allocation4], %s1673_s25, %s1673_s25, %s1674_s26  }
   0x6   :  { %s52_s28 = sshll.u32 %s1675_s27, 4  ;;  %s53_s28 = int_to_ptr.vmem [resolvable:$true] %s52_s28 }
   0x7   :  { %58 = dma.hbm_to_vmem [thread:$0]  %s51_s24, 3072, %s53_s28, [#allocation6], %s1673_s25, %s1673_s25, %s1674_s26  }
   0x8   :  { %1660 = dma.done.wait [#allocation4], 3072  }
   0x9   :  { %1661 = vsyncadd [#allocation4], 4294964224 }
   0xa   :  { %1662 = dma.done.wait [#allocation6], 3072  }
   0xb   :  { %1663 = vsyncadd [#allocation6], 4294964224  ;;  %v1745_v0 = vld [vmem:[%s2127_s6] sm:$0x1]  ;;  %v1434_v7 = vld [vmem:[#allocation3 + $0xac] sm:$0xf] }
   0xc   :  { %v1750_v1 = vld [vmem:[%s2126_s5] sm:$0xf]  ;;  %v1172_v8 = vld [vmem:[#allocation3 + $0xb4] sm:$0xf0]  ;;  %v1178_v9 = vld [vmem:[#allocation3 + $0xb0] sm:$0xf] }
   0xd   :  { %v1755_v2 = vld [vmem:[%s2122_s1] sm:$0xff]   ;;  %v383_v3 = vperm.slane %v1750_v1, 0  ;;  %v384_v4 = vperm.slane %v1750_v1, 1  ;;  %v385_v5 = vperm.slane %v1750_v1, 2  ;;  %v386_v6 = vperm.slane %v1750_v1, 3 }
   0xe   :  { %v1436_v10 = vld [vmem:[#allocation3 + $0xb8] sm:$0xf0]  ;;  %v1175_v11 = vor.u32 %v1434_v7, %v1172_v8  ;;  %v1431_v13 = vld [vmem:[#allocation3 + $0x94] sm:$0xf]  ;;  %v1160_v14 = vld [vmem:[#allocation3 + $0x9c] sm:$0xf0] }
   0xf   :  { %v1179_v12 = vor.u32 %v1436_v10, %v1178_v9  ;;  %v1166_v15 = vld [vmem:[#allocation3 + $0x98] sm:$0xf]  ;;  %v1433_v16 = vld [vmem:[#allocation3 + $0xa0] sm:$0xf0]  ;;  %v1170_v17 = vld [vmem:[#allocation3 + $0xa8] sm:$0xf]  ;;  %v1163_v19 = vor.u32 %v1431_v13, %v1160_v14 }
  0x10   :  { %v1435_v18 = vld [vmem:[#allocation3 + $0xb0] sm:$0xf0]  ;;  %298 = vmatpush.bf16.msra.mxu1 %v1175_v11  ;;  %v1167_v20 = vor.u32 %v1433_v16, %v1166_v15  ;;  %v1428_v22 = vld [vmem:[#allocation3 + $0x7c] sm:$0xf]  ;;  %v1148_v23 = vld [vmem:[#allocation3 + $0x84] sm:$0xf0] }
  0x11   :  { %327 = vmatpush.bf16.msra.mxu2 %v1179_v12  ;;  %v1171_v21 = vor.u32 %v1435_v18, %v1170_v17  ;;  %v1154_v24 = vld [vmem:[#allocation3 + $0x80] sm:$0xf]  ;;  %v1430_v25 = vld [vmem:[#allocation3 + $0x88] sm:$0xf0]  ;;  %v1158_v26 = vld [vmem:[#allocation3 + $0x90] sm:$0xf]  ;;  %v1151_v31 = vor.u32 %v1428_v22, %v1148_v23 }
  0x12   :  { %v1432_v27 = vld [vmem:[#allocation3 + $0x98] sm:$0xf0]  ;;  %v1146_v29 = vld [vmem:[#allocation3 + $0x78] sm:$0xf]  ;;  %v1429_v30 = vld [vmem:[#allocation3 + $0x80] sm:$0xf0]  ;;  %v1155_v32 = vor.u32 %v1430_v25, %v1154_v24 }
  0x13   :  { %1532 = vmatpush.bf16.msra.mxu3 %v1171_v21  ;;  %v1159_v28 = vor.u32 %v1432_v27, %v1158_v26  ;;  %269 = vmatpush.bf16.msra.mxu0 %v1171_v21  ;;  %v1425_v33 = vld [vmem:[#allocation3 + $0x64] sm:$0xf]  ;;  %v1136_v34 = vld [vmem:[#allocation3 + $0x6c] sm:$0xf0]  ;;  %v1142_v35 = vld [vmem:[#allocation3 + $0x68] sm:$0xf]  ;;  %v1147_v37 = vor.u32 %v1429_v30, %v1146_v29 }
  0x14   :  { %299 = vmatpush.bf16.msra.mxu1 %v1163_v19  ;;  %v1427_v36 = vld [vmem:[#allocation3 + $0x70] sm:$0xf0]  ;;  %v1134_v38 = vld [vmem:[#allocation3 + $0x60] sm:$0xf]  ;;  %v1426_v39 = vld [vmem:[#allocation3 + $0x68] sm:$0xf0]  ;;  %v1139_v40 = vor.u32 %v1425_v33, %v1136_v34 }
  0x15   :  { %328 = vmatpush.bf16.msra.mxu2 %v1167_v20  ;;  %v1143_v41 = vor.u32 %v1427_v36, %v1142_v35  ;;  %v1422_v42 = vld [vmem:[#allocation3 + $0x4c] sm:$0xf]  ;;  %v1124_v43 = vld [vmem:[#allocation3 + $0x54] sm:$0xf0]  ;;  %v1130_v44 = vld [vmem:[#allocation3 + $0x50] sm:$0xf]  ;;  %v1135_v46 = vor.u32 %v1426_v39, %v1134_v38 }
  0x16   :  { %v1424_v45 = vld [vmem:[#allocation3 + $0x58] sm:$0xf0]  ;;  %v1122_v47 = vld [vmem:[#allocation3 + $0x48] sm:$0xf]  ;;  %v1423_v48 = vld [vmem:[#allocation3 + $0x50] sm:$0xf0]  ;;  %v1127_v49 = vor.u32 %v1422_v42, %v1124_v43 }
  0x17   :  { %1533 = vmatpush.bf16.msra.mxu3 %v1159_v28  ;;  %270 = vmatpush.bf16.msra.mxu0 %v1159_v28  ;;  %v1131_v50 = vor.u32 %v1424_v45, %v1130_v44  ;;  %v1419_v51 = vld [vmem:[#allocation3 + $0x34] sm:$0xf]  ;;  %v1112_v52 = vld [vmem:[#allocation3 + $0x3c] sm:$0xf0]  ;;  %v1118_v53 = vld [vmem:[#allocation3 + $0x38] sm:$0xf]  ;;  %v1123_v55 = vor.u32 %v1423_v48, %v1122_v47 }
  0x18   :  { %300 = vmatpush.bf16.msra.mxu1 %v1151_v31  ;;  %v1421_v54 = vld [vmem:[#allocation3 + $0x40] sm:$0xf0]  ;;  %v1110_v56 = vld [vmem:[#allocation3 + $0x30] sm:$0xf]  ;;  %v1420_v57 = vld [vmem:[#allocation3 + $0x38] sm:$0xf0]  ;;  %v1115_v58 = vor.u32 %v1419_v51, %v1112_v52 }
  0x19   :  { %329 = vmatpush.bf16.msra.mxu2 %v1155_v32  ;;  %v1119_v59 = vor.u32 %v1421_v54, %v1118_v53  ;;  %v1416_v60 = vld [vmem:[#allocation3 + $0x1c] sm:$0xf]  ;;  %v1100_v61 = vld [vmem:[#allocation3 + $0x24] sm:$0xf0]  ;;  %v1106_v62 = vld [vmem:[#allocation3 + $0x20] sm:$0xf]  ;;  %v1111_v7 = vor.u32 %v1420_v57, %v1110_v56 }
  0x1a   :  { %v1418_v63 = vld [vmem:[#allocation3 + $0x28] sm:$0xf0]  ;;  %v1098_v8 = vld [vmem:[#allocation3 + $0x18] sm:$0xf]  ;;  %v1417_v9 = vld [vmem:[#allocation3 + $0x20] sm:$0xf0]  ;;  %v1103_v10 = vor.u32 %v1416_v60, %v1100_v61 }
  0x1b   :  { %1534 = vmatpush.bf16.msra.mxu3 %v1147_v37  ;;  %271 = vmatpush.bf16.msra.mxu0 %v1147_v37  ;;  %v1107_v11 = vor.u32 %v1418_v63, %v1106_v62  ;;  %v1413_v12 = vld [vmem:[#allocation3 + $0x4] sm:$0xf]  ;;  %v1088_v13 = vld [vmem:[#allocation3 + $0xc] sm:$0xf0]  ;;  %v1094_v14 = vld [vmem:[#allocation3 + $0x8] sm:$0xf]  ;;  %v1099_v16 = vor.u32 %v1417_v9, %v1098_v8 }
  0x1c   :  { %301 = vmatpush.bf16.msra.mxu1 %v1139_v40  ;;  %v1415_v15 = vld [vmem:[#allocation3 + $0x10] sm:$0xf0]  ;;  %v1086_v17 = vld [vmem:[#allocation3] sm:$0xf]  ;;  %v1414_v18 = vld [vmem:[#allocation3 + $0x8] sm:$0xf0]  ;;  %v1091_v19 = vor.u32 %v1413_v12, %v1088_v13 }
  0x1d   :  { %330 = vmatpush.bf16.msra.mxu2 %v1143_v41  ;;  %v1095_v20 = vor.u32 %v1415_v15, %v1094_v14  ;;  %v1087_v21 = vor.u32 %v1414_v18, %v1086_v17  ;;  %v1409_v22 = vld [vmem:[%s2121_s0] sm:$0xff]  ;;  %v1410_v23 = vld [vmem:[%s2121_s0 + $0x8] sm:$0xff]  ;;  %v1411_v24 = vld [vmem:[%s2121_s0 + $0x10] sm:$0xff] }
  0x1e   :  { %v1412_v25 = vld [vmem:[%s2121_s0 + $0x18] sm:$0xff]  ;;  %v109_v26 = vld [vmem:[%s2130_s9] sm:$0x7]  ;;  %s1799_s0 = smov 0  }
  0x1f   :  { %1535 = vmatpush.bf16.msra.mxu3 %v1135_v46  ;;  %272 = vmatpush.bf16.msra.mxu0 %v1135_v46  ;;  %v1776_v27 = vperm.slane %v109_v26, 1  ;;  %v1779_v30 = vperm.slane %v109_v26, 2  ;;  %v111_v31 = vperm.slane %v109_v26, 0 }
  0x20   :  { %302 = vmatpush.bf16.msra.mxu1 %v1127_v49 }
  0x21   :  { %331 = vmatpush.bf16.msra.mxu2 %v1131_v50 }
  0x23   :  { %1536 = vmatpush.bf16.msra.mxu3 %v1123_v55  ;;  %273 = vmatpush.bf16.msra.mxu0 %v1123_v55 }
  0x24   :  { %303 = vmatpush.bf16.msra.mxu1 %v1115_v58 }
  0x25   :  { %332 = vmatpush.bf16.msra.mxu2 %v1119_v59 }
  0x27   :  { %1537 = vmatpush.bf16.msra.mxu3 %v1111_v7  ;;  %274 = vmatpush.bf16.msra.mxu0 %v1111_v7 }
  0x28   :  { %304 = vmatpush.bf16.msra.mxu1 %v1103_v10 }
  0x29   :  { %333 = vmatpush.bf16.msra.mxu2 %v1107_v11 }
  0x2b   :  { %1538 = vmatpush.bf16.msra.mxu3 %v1099_v16  ;;  %275 = vmatpush.bf16.msra.mxu0 %v1099_v16 }
  0x2c   :  { %305 = vmatpush.bf16.msra.mxu1 %v1091_v19 }
  0x2d   :  { %334 = vmatpush.bf16.msra.mxu2 %v1095_v20 }
  0x2f   :  { %1539 = vmatpush.bf16.msra.mxu3 %v1087_v21  ;;  %276 = vmatpush.bf16.msra.mxu0 %v1087_v21 }
  0x30   :  { %306 = vmatmul.bf16.vlgmr.msra.gmra.mxu1 %v1409_v22  ;;  %335 = vmatmul.bf16.vlgmr.msra.gmra.mxu2 %v1409_v22 }
  0x32   :  { %282 = vmatmul.bf16.vlgmr.msra.gmra.mxu3 %v1410_v23  ;;  %277 = vmatmul.bf16.vlgmr.msra.gmra.mxu0 %v1409_v22 }
  0x40   :  { %311 = vmatmul.bf16.gmra.mxu1 %v1410_v23  ;;  %340 = vmatmul.bf16.gmra.mxu2 %v1410_v23 }
  0x42   :  { %287 = vmatmul.bf16.gmra.mxu3 %v1411_v24 }
  0x50   :  { %316 = vmatmul.bf16.gmra.mxu1 %v1411_v24  ;;  %345 = vmatmul.bf16.gmra.mxu2 %v1411_v24 }
  0x52   :  { %292 = vmatmul.bf16.gmra.mxu3 %v1412_v25 }
  0x60   :  { %321 = vmatmul.bf16.gmra.mxu1 %v1412_v25  ;;  %350 = vmatmul.bf16.gmra.mxu2 %v1412_v25 }
  0xad   :  { %v307_v28 = vpop.f32.mrf.mxu1 }
  0xae   :  { %v308_v29 = vadd.f32 %v307_v28, %v1776_v27 }
  0xaf   :  { %v278_v38 = vpop.f32.mrf.mxu0 }
  0xb0   :  { %357 = vst [vmem:[#allocation2 + $0x8] sm:$0xff] %v308_v29  ;;  %v279_v39 = vadd.f32 %v278_v38, %v111_v31 }
  0xb2   :  { %356 = vst [vmem:[#allocation2] sm:$0xff] %v279_v39 }
  0xb3   :  { %v336_v32 = vpop.f32.mrf.mxu2 }
  0xb4   :  { %v337_v33 = vadd.f32 %v336_v32, %v1779_v30 }
  0xb5   :  { %v309_v34 = vpop.f32.mrf.mxu1  ;;  %v283_v35 = vpop.f32.mrf.mxu3 }
  0xb6   :  { %358 = vst [vmem:[#allocation2 + $0x10] sm:$0xff] %v337_v33  ;;  %v310_v36 = vadd.f32 %v309_v34, %v1776_v27  ;;  %v284_v37 = vadd.f32 %v283_v35, %v111_v31 }
  0xb7   :  { %v280_v46 = vpop.f32.mrf.mxu0 }
  0xb8   :  { %360 = vst [vmem:[#allocation2 + $0x20] sm:$0xff] %v310_v36  ;;  %v281_v47 = vadd.f32 %v280_v46, %v111_v31 }
  0xb9   :  { %362 = vst [vmem:[#allocation2 + $0x30] sm:$0xff] %v284_v37 }
  0xba   :  { %359 = vst [vmem:[#allocation2 + $0x18] sm:$0xff] %v281_v47 }
  0xbb   :  { %v338_v40 = vpop.f32.mrf.mxu2 }
  0xbc   :  { %v339_v41 = vadd.f32 %v338_v40, %v1779_v30 }
  0xbd   :  { %v312_v42 = vpop.f32.mrf.mxu1  ;;  %v285_v43 = vpop.f32.mrf.mxu3 }
  0xbe   :  { %361 = vst [vmem:[#allocation2 + $0x28] sm:$0xff] %v339_v41  ;;  %v313_v44 = vadd.f32 %v312_v42, %v1776_v27  ;;  %v286_v45 = vadd.f32 %v285_v43, %v111_v31 }
  0xc0   :  { %363 = vst [vmem:[#allocation2 + $0x38] sm:$0xff] %v313_v44 }
  0xc1   :  { %365 = vst [vmem:[#allocation2 + $0x48] sm:$0xff] %v286_v45 }
  0xc3   :  { %v341_v48 = vpop.f32.mrf.mxu2 }
  0xc4   :  { %v342_v49 = vadd.f32 %v341_v48, %v1779_v30 }
  0xc5   :  { %v314_v50 = vpop.f32.mrf.mxu1  ;;  %v288_v51 = vpop.f32.mrf.mxu3 }
  0xc6   :  { %364 = vst [vmem:[#allocation2 + $0x40] sm:$0xff] %v342_v49  ;;  %v315_v52 = vadd.f32 %v314_v50, %v1776_v27  ;;  %v289_v53 = vadd.f32 %v288_v51, %v111_v31 }
  0xc8   :  { %366 = vst [vmem:[#allocation2 + $0x50] sm:$0xff] %v315_v52 }
  0xc9   :  { %368 = vst [vmem:[#allocation2 + $0x60] sm:$0xff] %v289_v53 }
  0xcb   :  { %v343_v54 = vpop.f32.mrf.mxu2 }
  0xcc   :  { %v344_v55 = vadd.f32 %v343_v54, %v1779_v30 }
  0xcd   :  { %v317_v56 = vpop.f32.mrf.mxu1  ;;  %v290_v57 = vpop.f32.mrf.mxu3 }
  0xce   :  { %367 = vst [vmem:[#allocation2 + $0x58] sm:$0xff] %v344_v55  ;;  %v318_v58 = vadd.f32 %v317_v56, %v1776_v27  ;;  %v291_v59 = vadd.f32 %v290_v57, %v111_v31 }
  0xd0   :  { %369 = vst [vmem:[#allocation2 + $0x68] sm:$0xff] %v318_v58 }
  0xd1   :  { %371 = vst [vmem:[#allocation2 + $0x78] sm:$0xff] %v291_v59 }
  0xd3   :  { %v346_v60 = vpop.f32.mrf.mxu2 }
  0xd4   :  { %v347_v61 = vadd.f32 %v346_v60, %v1779_v30 }
  0xd5   :  { %v319_v62 = vpop.f32.mrf.mxu1  ;;  %v293_v63 = vpop.f32.mrf.mxu3 }
  0xd6   :  { %370 = vst [vmem:[#allocation2 + $0x70] sm:$0xff] %v347_v61  ;;  %v320_v7 = vadd.f32 %v319_v62, %v1776_v27  ;;  %v294_v8 = vadd.f32 %v293_v63, %v111_v31 }
  0xd8   :  { %372 = vst [vmem:[#allocation2 + $0x80] sm:$0xff] %v320_v7 }
  0xd9   :  { %374 = vst [vmem:[#allocation2 + $0x90] sm:$0xff] %v294_v8 }
  0xdb   :  { %v348_v9 = vpop.f32.mrf.mxu2 }
  0xdc   :  { %v349_v10 = vadd.f32 %v348_v9, %v1779_v30 }
  0xdd   :  { %v322_v11 = vpop.f32.mrf.mxu1  ;;  %v295_v12 = vpop.f32.mrf.mxu3 }
  0xde   :  { %373 = vst [vmem:[#allocation2 + $0x88] sm:$0xff] %v349_v10  ;;  %v323_v13 = vadd.f32 %v322_v11, %v1776_v27  ;;  %v296_v14 = vadd.f32 %v295_v12, %v111_v31 }
  0xe0   :  { %375 = vst [vmem:[#allocation2 + $0x98] sm:$0xff] %v323_v13 }
  0xe1   :  { %377 = vst [vmem:[#allocation2 + $0xa8] sm:$0xff] %v296_v14 }
  0xe3   :  { %v351_v15 = vpop.f32.mrf.mxu2 }
  0xe4   :  { %v352_v16 = vadd.f32 %v351_v15, %v1779_v30 }
  0xe5   :  { %v324_v17 = vpop.f32.mrf.mxu1 }
  0xe6   :  { %376 = vst [vmem:[#allocation2 + $0xa0] sm:$0xff] %v352_v16  ;;  %v325_v18 = vadd.f32 %v324_v17, %v1776_v27 }
  0xe8   :  { %378 = vst [vmem:[#allocation2 + $0xb0] sm:$0xff] %v325_v18 }
  0xeb   :  { %v353_v19 = vpop.f32.mrf.mxu2 }
  0xec   :  { %v354_v20 = vadd.f32 %v353_v19, %v1779_v30 }
  0xee   :  { %379 = vst [vmem:[#allocation2 + $0xb8] sm:$0xff] %v354_v20 }
  0xef LB: > { %v1294_v21 = vld [vmem:[%s2125_s4 + $0xe0] sm:$0xf]  ;;  %v1467_v22 = vld [vmem:[%s2125_s4 + $0xec] sm:$0xf0]  ;;  %v1857_v45 = vpack.c.bf16 %v1666_v2, %v1666_v2  ;;  %v1526_v47 = vld [vmem:[%s2124_s3 + $0x8] sm:$0xff]   ;;  %v677_v62 = vperm.slane %v1745_v0, 0  ;;  %s1670_s0 = sphi %s1799_s0, %s397_s0   ;;  %v1666_v2 = vphi %v1755_v2, %v1036_v2  }
  0xf0   : > { %v1278_v23 = vld [vmem:[%s2125_s4 + $0xc0] sm:$0xf]  ;;  %v1295_v24 = vor.u32 %v1467_v22, %v1294_v21  ;;  %v1463_v25 = vld [vmem:[%s2125_s4 + $0xcc] sm:$0xf0]  ;;  %v1500_v50 = vunpack.c.l.bf16 %v1526_v47  ;;  %v1501_v58 = vunpack.c.h.bf16 %v1526_v47  ;;  %v1528_v8 = vld [vmem:[%s2124_s3 + $0x18] sm:$0xff]   ;;  %s1407_s15 = sshll.u32 %s1670_s0, 2 }
  0xf1   : > { %v1279_v26 = vor.u32 %v1463_v25, %v1278_v23  ;;  %v1262_v27 = vld [vmem:[%s2125_s4 + $0xa0] sm:$0xf]  ;;  %v1459_v28 = vld [vmem:[%s2125_s4 + $0xac] sm:$0xf0]  ;;  %v1509_v12 = vunpack.c.h.bf16 %v1528_v8  ;;  %v1508_v15 = vunpack.c.l.bf16 %v1528_v8  ;;  %v1216_v8 = vld [vmem:[%s2125_s4 + $0x50] sm:$0xf0]  ;;  %s1042_s18 = scalar_lea.vmem %s2132_s11, %s1407_s15  ;;  %s1039_s22 = scalar_lea.vmem %s2131_s10, %s1407_s15 }
  0xf2   : > { %592 = vmatpush.bf16.msra.mxu0 %v1295_v24  ;;  %v1263_v29 = vor.u32 %v1459_v28, %v1262_v27  ;;  %v1246_v30 = vld [vmem:[%s2125_s4 + $0x80] sm:$0xf]  ;;  %v1455_v31 = vld [vmem:[%s2125_s4 + $0x8c] sm:$0xf0]  ;;  %s1469_s19 = smul.u32 24, %s1670_s0  ;;  %s397_s0 = sadd.s32 1, %s1670_s0  }
  0xf3   : > { %v1247_v32 = vor.u32 %v1455_v31, %v1246_v30  ;;  %v1230_v33 = vld [vmem:[%s2125_s4 + $0x60] sm:$0xf]  ;;  %v1451_v34 = vld [vmem:[%s2125_s4 + $0x6c] sm:$0xf0]  ;;  %v1296_v30 = vld [vmem:[%s2125_s4 + $0xf0] sm:$0xf0] }
  0xf4   : > { %v1231_v35 = vor.u32 %v1451_v34, %v1230_v33  ;;  %v1214_v36 = vld [vmem:[%s2125_s4 + $0x40] sm:$0xf]  ;;  %v1447_v37 = vld [vmem:[%s2125_s4 + $0x4c] sm:$0xf0]  ;;  %v1302_v31 = vld [vmem:[%s2125_s4 + $0xe8] sm:$0xf] }
  0xf5   : > { %v1215_v38 = vor.u32 %v1447_v37, %v1214_v36  ;;  %v1198_v39 = vld [vmem:[%s2125_s4 + $0x20] sm:$0xf]  ;;  %v1443_v40 = vld [vmem:[%s2125_s4 + $0x2c] sm:$0xf0]  ;;  %v1468_v33 = vld [vmem:[%s2125_s4 + $0xf4] sm:$0xf0] }
  0xf6   : > { %593 = vmatpush.bf16.msra.mxu0 %v1279_v26  ;;  %v1199_v41 = vor.u32 %v1443_v40, %v1198_v39  ;;  %v1182_v42 = vld [vmem:[%s2125_s4] sm:$0xf]  ;;  %v1439_v43 = vld [vmem:[%s2125_s4 + $0xc] sm:$0xf0]  ;;  %v1303_v34 = vor.u32 %v1468_v33, %v1302_v31  ;;  %v1280_v36 = vld [vmem:[%s2125_s4 + $0xd0] sm:$0xf0] }
  0xf7   : > { %v1183_v44 = vor.u32 %v1439_v43, %v1182_v42  ;;  %v1527_v46 = vld [vmem:[%s2124_s3 + $0x10] sm:$0xff]   ;;  %v1495_v48 = vld [vmem:[%s2124_s3] sm:$0xff]   ;;  %v1286_v37 = vld [vmem:[%s2125_s4 + $0xc8] sm:$0xf]  ;;  %s2099_s20 = scalar_lea.vmem [#allocation2], %s1469_s19  ;;  %p394_p0 = scmp.ge.s32.totalorder %s397_s0, 8  }
  0xf8   : > { %v1504_v49 = vunpack.c.l.bf16 %v1527_v46  ;;  %v1496_v51 = vunpack.c.l.bf16 %v1495_v48  ;;  %v1505_v57 = vunpack.c.h.bf16 %v1527_v46  ;;  %v1497_v59 = vunpack.c.h.bf16 %v1495_v48  ;;  %618 = vmatpush.bf16.msra.mxu2 %v1303_v34  ;;  %v1464_v39 = vld [vmem:[%s2125_s4 + $0xd4] sm:$0xf0]  ;;  %v1264_v42 = vld [vmem:[%s2125_s4 + $0xb0] sm:$0xf0]  ;;  %v1270_v43 = vld [vmem:[%s2125_s4 + $0xa8] sm:$0xf] }
  0xf9   : > { %v1287_v40 = vor.u32 %v1464_v39, %v1286_v37  ;;  %v1460_v46 = vld [vmem:[%s2125_s4 + $0xb4] sm:$0xf0]  ;;  %v1492_v31 = vld [vmem:[#allocation5 + $0xb0] sm:$0xf0] }
  0xfa   : > { %594 = vmatpush.bf16.msra.mxu0 %v1263_v29  ;;  %v1465_v29 = vld [vmem:[%s2125_s4 + $0xe4] sm:$0xf]  ;;  %v1271_v47 = vor.u32 %v1460_v46, %v1270_v43  ;;  %v1397_v37 = vld [vmem:[#allocation5 + $0xb4] sm:$0xf0]  ;;  %v1489_v46 = vld [vmem:[#allocation5 + $0x98] sm:$0xf0] }
  0xfc   : > { %619 = vmatpush.bf16.msra.mxu2 %v1287_v40  ;;  %v1493_v40 = vld [vmem:[#allocation5 + $0xb8] sm:$0xf0] }
  0xfe   : > { %595 = vmatpush.bf16.msra.mxu0 %v1247_v32  ;;  %v1299_v32 = vor.u32 %v1465_v29, %v1296_v30  ;;  %v1440_v29 = vld [vmem:[%s2125_s4 + $0x14] sm:$0xf0]  ;;  %v1395_v30 = vld [vmem:[#allocation5 + $0xa8] sm:$0xf] }
 0x100   : > { %605 = vmatpush.bf16.msra.mxu1 %v1299_v32  ;;  %620 = vmatpush.bf16.msra.mxu2 %v1271_v47  ;;  %v1488_v47 = vld [vmem:[#allocation5 + $0x94] sm:$0xf] }
 0x102   : > { %596 = vmatpush.bf16.msra.mxu0 %v1231_v35  ;;  %v1461_v35 = vld [vmem:[%s2125_s4 + $0xc4] sm:$0xf] }
 0x106   : > { %597 = vmatpush.bf16.msra.mxu0 %v1215_v38  ;;  %v1283_v38 = vor.u32 %v1461_v35, %v1280_v36  ;;  %v1396_v35 = vor.u32 %v1492_v31, %v1395_v30  ;;  %v1491_v36 = vld [vmem:[#allocation5 + $0xac] sm:$0xf]  ;;  %v1484_v30 = vld [vmem:[#allocation5 + $0x70] sm:$0xf0] }
 0x107   : > { %v1400_v39 = vor.u32 %v1491_v36, %v1397_v37  ;;  %v1466_v31 = vld [vmem:[%s2125_s4 + $0xec] sm:$0xf] }
 0x108   : > { %606 = vmatpush.bf16.msra.mxu1 %v1283_v38  ;;  %v1403_v38 = vld [vmem:[#allocation5 + $0xb0] sm:$0xf]  ;;  %v1479_v37 = vld [vmem:[#allocation5 + $0x4c] sm:$0xf] }
 0x109   : > { %v1404_v43 = vor.u32 %v1493_v40, %v1403_v38  ;;  %v1349_v38 = vld [vmem:[#allocation5 + $0x54] sm:$0xf0] }
 0x10a   : > { %598 = vmatpush.bf16.msra.mxu0 %v1199_v41  ;;  %v1457_v41 = vld [vmem:[%s2125_s4 + $0xa4] sm:$0xf] }
 0x10e   : > { %599 = vmatpush.bf16.msra.mxu0 %v1183_v44  ;;  %v1267_v44 = vor.u32 %v1457_v41, %v1264_v42 }
 0x110   : > { %607 = vmatpush.bf16.msra.mxu1 %v1267_v44  ;;  %v1383_v44 = vld [vmem:[#allocation5 + $0x90] sm:$0xf] }
 0x111   : > { %600 = vmatmul.bf16.vlgmr.msra.gmra.mxu0 %v1857_v45 }
 0x112   : > { %948 = vmatpush.bf16.msrb.mxu0 %v1396_v35  ;;  %v1480_v35 = vld [vmem:[#allocation5 + $0x50] sm:$0xf0] }
 0x18e   : > { %v601_v52 = vpop.f32.mrf.mxu0 }
 0x18f   : > { %v602_v53 = vadd.f32 %v601_v52, %v383_v3 }
 0x191   : > { %v664_v54 = vadd.f32 %v1504_v49, %v602_v53  ;;  %v662_v55 = vadd.f32 %v1500_v50, %v602_v53  ;;  %v660_v56 = vadd.f32 %v1496_v51, %v602_v53  ;;  %v665_v60 = vadd.f32 %v1505_v57, %v602_v53  ;;  %v1453_v49 = vld [vmem:[%s2125_s4 + $0x84] sm:$0xf]  ;;  %v1248_v50 = vld [vmem:[%s2125_s4 + $0x90] sm:$0xf0]  ;;  %v1254_v51 = vld [vmem:[%s2125_s4 + $0x88] sm:$0xf] }
 0x192   : > { %v663_v63 = vadd.f32 %v1501_v58, %v602_v53  ;;  %v661_v7 = vadd.f32 %v1497_v59, %v602_v53  ;;  %v667_v17 = vadd.f32 %v1509_v12, %v602_v53  ;;  %v666_v19 = vadd.f32 %v1508_v15, %v602_v53  ;;  %v1449_v57 = vld [vmem:[%s2125_s4 + $0x64] sm:$0xf]  ;;  %v1232_v58 = vld [vmem:[%s2125_s4 + $0x70] sm:$0xf0]  ;;  %v1238_v59 = vld [vmem:[%s2125_s4 + $0x68] sm:$0xf] }
 0x193   : > { %1560 = vtanh.f32 %v664_v54  ;;  %v1251_v53 = vor.u32 %v1453_v49, %v1248_v50  ;;  %v1456_v54 = vld [vmem:[%s2125_s4 + $0x94] sm:$0xf0]  ;;  %v1200_v15 = vld [vmem:[%s2125_s4 + $0x30] sm:$0xf0]  ;;  %v1384_v50 = vor.u32 %v1489_v46, %v1383_v44 }
 0x194   : > { %1562 = vtanh.f32 %v662_v55  ;;  %v1255_v55 = vor.u32 %v1456_v54, %v1254_v51  ;;  %v1448_v12 = vld [vmem:[%s2125_s4 + $0x54] sm:$0xf0]  ;;  %v1385_v51 = vld [vmem:[#allocation5 + $0x9c] sm:$0xf0]  ;;  %v1490_v54 = vld [vmem:[#allocation5 + $0xa0] sm:$0xf0] }
 0x195   : > { %1564 = vtanh.f32 %v660_v56  ;;  %608 = vmatpush.bf16.msra.mxu1 %v1251_v53  ;;  %v1391_v53 = vld [vmem:[#allocation5 + $0x98] sm:$0xf]  ;;  %949 = vmatpush.bf16.msrb.mxu0 %v1384_v50  ;;  %v1335_v50 = vld [vmem:[#allocation5 + $0x30] sm:$0xf] }
 0x196   : > { %v603_v61 = vpop.f32.mrf.mxu0  ;;  %1566 = vtanh.f32 %v665_v60  ;;  %621 = vmatpush.bf16.msra.mxu2 %v1255_v55  ;;  %v1235_v60 = vor.u32 %v1449_v57, %v1232_v58  ;;  %v1388_v55 = vor.u32 %v1488_v47, %v1385_v51  ;;  %v1392_v57 = vor.u32 %v1490_v54, %v1391_v53  ;;  %v1477_v51 = vld [vmem:[#allocation5 + $0x38] sm:$0xf0] }
 0x197   : > { %1568 = vtanh.f32 %v663_v63  ;;  %v1452_v61 = vld [vmem:[%s2125_s4 + $0x74] sm:$0xf0]  ;;  %v1352_v47 = vor.u32 %v1479_v37, %v1349_v38 }
 0x198   : > { %1570 = vtanh.f32 %v661_v7  ;;  %v1445_v7 = vld [vmem:[%s2125_s4 + $0x44] sm:$0xf] }
 0x199   : > { %v1561_v9 = vpop.eup %1560  ;;  %1572 = vtanh.f32 %v667_v17  ;;  %609 = vmatpush.bf16.msra.mxu1 %v1235_v60 }
 0x19a   : > { %v1563_v10 = vpop.eup %1562  ;;  %v683_v11 = vmul.f32 %v1561_v9, %v677_v62  ;;  %1574 = vtanh.f32 %v666_v19  ;;  %v1222_v9 = vld [vmem:[%s2125_s4 + $0x48] sm:$0xf]  ;;  %v1444_v19 = vld [vmem:[%s2125_s4 + $0x34] sm:$0xf0] }
 0x19b   : > { %v1565_v13 = vpop.eup %1564  ;;  %v681_v14 = vmul.f32 %v1563_v10, %v677_v62 }
 0x19c   : > { %695 = vadd.xlane.f32.xlu2 %v683_v11  ;;  %v679_v16 = vmul.f32 %v1565_v13, %v677_v62  ;;  %v1567_v18 = vpop.eup %1566  ;;  %v1219_v11 = vor.u32 %v1445_v7, %v1216_v8  ;;  %v1223_v13 = vor.u32 %v1448_v12, %v1222_v9  ;;  %v1486_v9 = vld [vmem:[#allocation5 + $0x80] sm:$0xf0] }
 0x19d   : > { %691 = vadd.xlane.f32.xlu1 %v681_v14  ;;  %v1569_v20 = vpop.eup %1568  ;;  %v684_v22 = vmul.f32 %v1567_v18, %v677_v62  ;;  %v1441_v14 = vld [vmem:[%s2125_s4 + $0x24] sm:$0xf] }
 0x19e   : > { %687 = vadd.xlane.f32.xlu0 %v679_v16  ;;  %v1571_v21 = vpop.eup %1570  ;;  %v682_v23 = vmul.f32 %v1569_v20, %v677_v62  ;;  %610 = vmatpush.bf16.msra.mxu1 %v1219_v11  ;;  %v1206_v16 = vld [vmem:[%s2125_s4 + $0x28] sm:$0xf]  ;;  %v1203_v18 = vor.u32 %v1441_v14, %v1200_v15 }
 0x19f   : > { %v680_v24 = vmul.f32 %v1571_v21, %v677_v62  ;;  %v1573_v25 = vpop.eup %1572  ;;  %v1207_v20 = vor.u32 %v1444_v19, %v1206_v16  ;;  %v1487_v19 = vld [vmem:[#allocation5 + $0x88] sm:$0xf0] }
 0x1a0   : > { %v1575_v26 = vpop.eup %1574  ;;  %v686_v27 = vmul.f32 %v1573_v25, %v677_v62  ;;  %v1190_v25 = vld [vmem:[%s2125_s4 + $0x8] sm:$0xf] }
 0x1a1   : > { %v685_v28 = vmul.f32 %v1575_v26, %v677_v62  ;;  %v1239_v62 = vor.u32 %v1452_v61, %v1238_v59  ;;  %v1191_v34 = vor.u32 %v1440_v29, %v1190_v25  ;;  %v1361_v25 = vld [vmem:[#allocation5 + $0x6c] sm:$0xf0]  ;;  %v1367_v29 = vld [vmem:[#allocation5 + $0x68] sm:$0xf] }
 0x1a2   : > { %611 = vmatpush.bf16.msra.mxu1 %v1203_v18  ;;  %v1379_v18 = vld [vmem:[#allocation5 + $0x80] sm:$0xf] }
 0x1a3   : > { %622 = vmatpush.bf16.msra.mxu2 %v1239_v62 }
 0x1a4   : > { %697 = vadd.xlane.f32.xlu2 %v684_v22 }
 0x1a5   : > { %693 = vadd.xlane.f32.xlu1 %v682_v23  ;;  %v1437_v23 = vld [vmem:[%s2125_s4 + $0x4] sm:$0xf] }
 0x1a6   : > { %689 = vadd.xlane.f32.xlu0 %v680_v24  ;;  %v1184_v24 = vld [vmem:[%s2125_s4 + $0x10] sm:$0xf0] }
 0x1a7   : > { %623 = vmatpush.bf16.msra.mxu2 %v1223_v13 }
 0x1ab   : > { %624 = vmatpush.bf16.msra.mxu2 %v1207_v20  ;;  %v1359_v20 = vld [vmem:[#allocation5 + $0x60] sm:$0xf] }
 0x1ad   : > { %701 = vadd.xlane.f32.xlu1 %v686_v27 }
 0x1ae   : > { %699 = vadd.xlane.f32.xlu0 %v685_v28  ;;  %v1187_v28 = vor.u32 %v1437_v23, %v1184_v24  ;;  %v1483_v23 = vld [vmem:[#allocation5 + $0x68] sm:$0xf0]  ;;  %v1482_v24 = vld [vmem:[#allocation5 + $0x64] sm:$0xf] }
 0x1af   : > { %625 = vmatpush.bf16.msra.mxu2 %v1191_v34  ;;  %v1347_v34 = vld [vmem:[#allocation5 + $0x48] sm:$0xf] }
 0x1b0   : > { %612 = vmatpush.bf16.msra.mxu1 %v1187_v28  ;;  %v1364_v28 = vor.u32 %v1482_v24, %v1361_v25  ;;  %v1348_v36 = vor.u32 %v1480_v35, %v1347_v34  ;;  %v1472_v34 = vld [vmem:[#allocation5 + $0x10] sm:$0xf0] }
 0x1b2   : > { %626 = vmatmul.bf16.vlgmr.msra.gmra.mxu2 %v1857_v45 }
 0x1b3   : > { %974 = vmatpush.bf16.msrb.mxu2 %v1404_v43  ;;  %613 = vmatmul.bf16.vlgmr.msra.gmra.mxu1 %v1857_v45  ;;  %v1288_v43 = vld [vmem:[%s2125_s4 + $0xd8] sm:$0xf0] }
 0x1b4   : > { %961 = vmatpush.bf16.msrb.mxu1 %v1400_v39  ;;  %v1355_v39 = vld [vmem:[#allocation5 + $0x50] sm:$0xf] }
 0x1b7   : > { %975 = vmatpush.bf16.msrb.mxu2 %v1392_v57  ;;  %v1337_v57 = vld [vmem:[#allocation5 + $0x3c] sm:$0xf0] }
 0x1b8   : > { %962 = vmatpush.bf16.msrb.mxu1 %v1388_v55  ;;  %v1476_v55 = vld [vmem:[#allocation5 + $0x34] sm:$0xf] }
 0x20f   : > { %v1927_v56 = vpop.xlane.xlu2 %695 }
 0x210   : > { %v1911_v48 = vpop.xlane.xlu1 %691 }
 0x211   : > { %v1922_v52 = vpop.xlane.xlu0 %687 }
 0x212   : > { %v703_v32 = vmax.f32 %v1922_v52, %v1927_v56 }
 0x217   : > { %v1966_v17 = vpop.xlane.xlu2 %697 }
 0x218   : > { %v1941_v63 = vpop.xlane.xlu1 %693 }
 0x219   : > { %v1952_v10 = vpop.xlane.xlu0 %689 }
 0x21a   : > { %v704_v21 = vmax.f32 %v1952_v10, %v1966_v17 }
 0x21c   : > { %v707_v41 = vmax.f32 %v703_v32, %v704_v21  ;;  %v1380_v21 = vor.u32 %v1487_v19, %v1379_v18  ;;  %v1368_v32 = vor.u32 %v1484_v30, %v1367_v29  ;;  %v1331_v18 = vld [vmem:[#allocation5 + $0x20] sm:$0xf]  ;;  %v1475_v19 = vld [vmem:[#allocation5 + $0x28] sm:$0xf0]  ;;  %v1470_v29 = vld [vmem:[#allocation5 + $0x4] sm:$0xf] }
 0x21d   : > { %v1313_v30 = vld [vmem:[#allocation5 + $0xc] sm:$0xf0] }
 0x21e   : > { %976 = vmatpush.bf16.msrb.mxu2 %v1380_v21  ;;  %v1311_v21 = vld [vmem:[#allocation5] sm:$0xf]  ;;  %v1316_v38 = vor.u32 %v1470_v29, %v1313_v30 }
 0x220   : > { %v1973_v22 = vpop.xlane.xlu1 %701 }
 0x221   : > { %v706_v26 = vmax.f32 %v1941_v63, %v1973_v22  ;;  %v700_v27 = vpop.xlane.xlu0 %699 }
 0x222   : > { %v705_v33 = vmax.f32 %v1911_v48, %v700_v27  ;;  %977 = vmatpush.bf16.msrb.mxu2 %v1368_v32 }
 0x224   : > { %v708_v42 = vmax.f32 %v705_v33, %v706_v26  ;;  %v1304_v33 = vld [vmem:[%s2125_s4 + $0xf8] sm:$0xf0] }
 0x226   : > { %v1992_v49 = vmax.f32 %v707_v41, %v708_v42  ;;  %v1481_v41 = vld [vmem:[#allocation5 + $0x58] sm:$0xf0]  ;;  %v1462_v42 = vld [vmem:[%s2125_s4 + $0xcc] sm:$0xf] }
 0x227   : > { %v1356_v54 = vor.u32 %v1481_v41, %v1355_v39 }
 0x228   : > { %v710_v58 = vsub.f32 %v1922_v52, %v1992_v49  ;;  %v711_v59 = vsub.f32 %v1952_v10, %v1992_v49  ;;  %v712_v60 = vsub.f32 %v1911_v48, %v1992_v49  ;;  %v713_v61 = vsub.f32 %v1941_v63, %v1992_v49  ;;  %v1371_v52 = vld [vmem:[#allocation5 + $0x78] sm:$0xf]  ;;  %v1485_v48 = vld [vmem:[#allocation5 + $0x7c] sm:$0xf] }
 0x229   : > { %v714_v62 = vsub.f32 %v1927_v56, %v1992_v49  ;;  %v715_v7 = vsub.f32 %v1966_v17, %v1992_v49  ;;  %v716_v8 = vsub.f32 %v700_v27, %v1992_v49  ;;  %v1372_v12 = vor.u32 %v1486_v9, %v1371_v52  ;;  %v1373_v56 = vld [vmem:[#allocation5 + $0x84] sm:$0xf0]  ;;  %v1323_v52 = vld [vmem:[#allocation5 + $0x18] sm:$0xf]  ;;  %v1474_v9 = vld [vmem:[#allocation5 + $0x20] sm:$0xf0]  ;;  %978 = vmatpush.bf16.msrb.mxu2 %v1356_v54 }
 0x22a   : > { %v718_v11 = vmul.f32 1.442695, %v710_v58  ;;  %v720_v10 = vmul.f32 1.442695, %v711_v59  ;;  %v722_v13 = vmul.f32 1.442695, %v712_v60  ;;  %v1376_v17 = vor.u32 %v1485_v48, %v1373_v56 }
 0x22b   : > { %v724_v14 = vmul.f32 1.442695, %v713_v61  ;;  %v726_v63 = vmul.f32 1.442695, %v714_v62  ;;  %v728_v15 = vmul.f32 1.442695, %v715_v7  ;;  %950 = vmatpush.bf16.msrb.mxu0 %v1372_v12  ;;  %v717_v26 = vsub.f32 %v1973_v22, %v1992_v49 }
 0x22c   : > { %1576 = vpow2.f32 %v718_v11  ;;  %v730_v16 = vmul.f32 1.442695, %v716_v8  ;;  %963 = vmatpush.bf16.msrb.mxu1 %v1376_v17  ;;  %v1360_v27 = vor.u32 %v1483_v23, %v1359_v20  ;;  %v1307_v22 = vor.u32 %v1466_v31, %v1304_v33  ;;  %v1343_v58 = vld [vmem:[#allocation5 + $0x38] sm:$0xf]  ;;  %v1478_v61 = vld [vmem:[#allocation5 + $0x40] sm:$0xf0] }
 0x22d   : > { %1578 = vpow2.f32 %v720_v10  ;;  %v732_v46 = vmul.f32 1.442695, %v717_v26  ;;  %v1291_v49 = vor.u32 %v1462_v42, %v1288_v43  ;;  %v1336_v60 = vor.u32 %v1477_v51, %v1335_v50  ;;  %v1458_v62 = vld [vmem:[%s2125_s4 + $0xac] sm:$0xf]  ;;  %v1272_v7 = vld [vmem:[%s2125_s4 + $0xb8] sm:$0xf0] }
 0x22e   : > { %1580 = vpow2.f32 %v722_v13  ;;  %631 = vmatpush.bf16.msra.mxu3 %v1307_v22  ;;  %v1340_v10 = vor.u32 %v1476_v55, %v1337_v57  ;;  %v1275_v12 = vor.u32 %v1458_v62, %v1272_v7  ;;  %v1473_v48 = vld [vmem:[#allocation5 + $0x1c] sm:$0xf]  ;;  %v1471_v23 = vld [vmem:[#allocation5 + $0x8] sm:$0xf0]  ;;  %v1319_v33 = vld [vmem:[#allocation5 + $0x8] sm:$0xf] }
 0x22f   : > { %1582 = vpow2.f32 %v724_v14  ;;  %951 = vmatpush.bf16.msrb.mxu0 %v1360_v27  ;;  %v1344_v14 = vor.u32 %v1478_v61, %v1343_v58  ;;  %v1256_v56 = vld [vmem:[%s2125_s4 + $0x98] sm:$0xf0]  ;;  %v1312_v32 = vor.u32 %v1471_v23, %v1311_v21  ;;  %v1450_v22 = vld [vmem:[%s2125_s4 + $0x6c] sm:$0xf]  ;;  %v1320_v42 = vor.u32 %v1472_v34, %v1319_v33 }
 0x230   : > { %1584 = vpow2.f32 %v726_v63  ;;  %964 = vmatpush.bf16.msrb.mxu1 %v1364_v28  ;;  %v1325_v63 = vld [vmem:[#allocation5 + $0x24] sm:$0xf0]  ;;  %v1332_v28 = vor.u32 %v1475_v19, %v1331_v18  ;;  %v1446_v43 = vld [vmem:[%s2125_s4 + $0x4c] sm:$0xf]  ;;  %v1208_v51 = vld [vmem:[%s2125_s4 + $0x38] sm:$0xf0] }
 0x231   : > { %1586 = vpow2.f32 %v728_v15  ;;  %v1454_v15 = vld [vmem:[%s2125_s4 + $0x8c] sm:$0xf]  ;;  %v1328_v25 = vor.u32 %v1473_v48, %v1325_v63  ;;  %979 = vmatpush.bf16.msrb.mxu2 %v1344_v14  ;;  %v1192_v61 = vld [vmem:[%s2125_s4 + $0x18] sm:$0xf0] }
 0x232   : > { %v2017_v40 = vpop.eup %1576  ;;  %1588 = vpow2.f32 %v730_v16  ;;  %632 = vmatpush.bf16.msra.mxu3 %v1291_v49  ;;  %v1324_v16 = vor.u32 %v1474_v9, %v1323_v52  ;;  %v1259_v26 = vor.u32 %v1454_v15, %v1256_v56  ;;  %v1511_v49 = vld [vmem:[%s2123_s2] sm:$0xff]   ;;  %v1442_v50 = vld [vmem:[%s2125_s4 + $0x2c] sm:$0xf] }
 0x233   : > { %v2025_v44 = vpop.eup %1578  ;;  %952 = vmatpush.bf16.msrb.mxu0 %v1348_v36  ;;  %1590 = vpow2.f32 %v732_v46  ;;  %v1240_v36 = vld [vmem:[%s2125_s4 + $0x78] sm:$0xf0]  ;;  %v1512_v54 = vunpack.c.l.bf16 %v1511_v49  ;;  %v1513_v55 = vunpack.c.h.bf16 %v1511_v49  ;;  %v1211_v57 = vor.u32 %v1442_v50, %v1208_v51 }
 0x234   : > { %v734_v53 = vadd.f32 %v2025_v44, %v2017_v40  ;;  %v2029_v59 = vpop.eup %1580  ;;  %965 = vmatpush.bf16.msrb.mxu1 %v1352_v47  ;;  %v1243_v39 = vor.u32 %v1450_v22, %v1240_v36  ;;  %v1224_v46 = vld [vmem:[%s2125_s4 + $0x58] sm:$0xf0]  ;;  %v784_v36 = vld [vmem:[%s2099_s20] sm:$0xff] }
 0x235   : > { %v2038_v11 = vpop.eup %1582  ;;  %980 = vmatpush.bf16.msrb.mxu2 %v1332_v28  ;;  %v1227_v47 = vor.u32 %v1446_v43, %v1224_v46  ;;  %v627_v33 = vpop.f32.mrf.mxu2 }
 0x236   : > { %v735_v8 = vadd.f32 %v2029_v59, %v734_v53  ;;  %v2047_v17 = vpop.eup %1584  ;;  %633 = vmatpush.bf16.msra.mxu3 %v1275_v12  ;;  %v1529_v53 = vld [vmem:[%s2123_s2 + $0x8] sm:$0xff]  }
 0x237   : > { %953 = vmatpush.bf16.msrb.mxu0 %v1336_v60  ;;  %v1587_v24 = vpop.eup %1586  ;;  %v1438_v60 = vld [vmem:[%s2125_s4 + $0xc] sm:$0xf]  ;;  %v1516_v52 = vunpack.c.l.bf16 %v1529_v53  ;;  %v1517_v9 = vunpack.c.h.bf16 %v1529_v53 }
 0x238   : > { %v736_v13 = vadd.f32 %v2038_v11, %v735_v8  ;;  %966 = vmatpush.bf16.msrb.mxu1 %v1340_v10  ;;  %v1589_v31 = vpop.eup %1588  ;;  %v1530_v10 = vld [vmem:[%s2123_s2 + $0x10] sm:$0xff]   ;;  %v1195_v14 = vor.u32 %v1438_v60, %v1192_v61 }
 0x239   : > { %v1591_v37 = vpop.eup %1590  ;;  %981 = vmatpush.bf16.msrb.mxu2 %v1320_v42  ;;  %v1520_v15 = vunpack.c.l.bf16 %v1530_v10 }
 0x23a   : > { %v737_v20 = vadd.f32 %v2047_v17, %v736_v13  ;;  %634 = vmatpush.bf16.msra.mxu3 %v1259_v26 }
 0x23b   : > { %954 = vmatpush.bf16.msrb.mxu0 %v1324_v16  ;;  %v1521_v16 = vunpack.c.h.bf16 %v1530_v10 }
 0x23c   : > { %v738_v27 = vadd.f32 %v1587_v24, %v737_v20  ;;  %967 = vmatpush.bf16.msrb.mxu1 %v1328_v25 }
 0x23e   : > { %v739_v35 = vadd.f32 %v1589_v31, %v738_v27  ;;  %635 = vmatpush.bf16.msra.mxu3 %v1243_v39 }
 0x23f   : > { %955 = vmatpush.bf16.msrb.mxu0 %v1312_v32 }
 0x240   : > { %v740_v41 = vadd.f32 %v1591_v37, %v739_v35  ;;  %968 = vmatpush.bf16.msrb.mxu1 %v1316_v38  ;;  %v629_v35 = vpop.f32.mrf.mxu2  ;;  %v628_v38 = vadd.f32 %v627_v33, %v385_v5 }
 0x242   : > { %1592 = vrcp.f32 %v740_v41  ;;  %636 = vmatpush.bf16.msra.mxu3 %v1227_v47 }
 0x246   : > { %637 = vmatpush.bf16.msra.mxu3 %v1211_v57 }
 0x248   : > { %v1593_v58 = vpop.eup %1592 }
 0x249   : > { %v742_v62 = vmul.f32 %v1593_v58, %v2017_v40  ;;  %v743_v7 = vmul.f32 %v1593_v58, %v2025_v44  ;;  %v744_v8 = vmul.f32 %v1593_v58, %v2029_v59  ;;  %v745_v12 = vmul.f32 %v1593_v58, %v2038_v11  ;;  %v1531_v44 = vld [vmem:[%s2123_s2 + $0x18] sm:$0xff]  }
 0x24a   : > { %v746_v63 = vmul.f32 %v1593_v58, %v2047_v17  ;;  %v747_v59 = vmul.f32 %v1593_v58, %v1587_v24  ;;  %638 = vmatpush.bf16.msra.mxu3 %v1195_v14  ;;  %v1524_v11 = vunpack.c.l.bf16 %v1531_v44  ;;  %v748_v20 = vmul.f32 %v1593_v58, %v1589_v31 }
 0x24b   : > { %v766_v48 = vmul.f32 %v1512_v54, %v742_v62  ;;  %v767_v13 = vmul.f32 %v1513_v55, %v743_v7  ;;  %v768_v40 = vmul.f32 %v1516_v52, %v744_v8  ;;  %v769_v18 = vmul.f32 %v1517_v9, %v745_v12 }
 0x24c   : > { %v770_v21 = vmul.f32 %v1520_v15, %v746_v63  ;;  %v749_v17 = vmul.f32 %v1593_v58, %v1591_v37  ;;  %v1525_v25 = vunpack.c.h.bf16 %v1531_v44  ;;  %v771_v26 = vmul.f32 %v1521_v16, %v747_v59  ;;  %v785_v37 = vld [vmem:[%s2099_s20 + $0x8] sm:$0xff]  ;;  %v786_v44 = vld [vmem:[%s2099_s20 + $0x10] sm:$0xff] }
 0x24d   : > { %v774_v56 = vadd.f32 %v767_v13, %v766_v48  ;;  %639 = vmatmul.bf16.vlgmr.msra.gmra.mxu3 %v1857_v45  ;;  %v772_v28 = vmul.f32 %v1524_v11, %v748_v20  ;;  %v614_v45 = vpop.f32.mrf.mxu1 }
 0x24e   : > { %v773_v24 = vmul.f32 %v1525_v25, %v749_v17  ;;  %v615_v42 = vadd.f32 %v614_v45, %v384_v4 }
 0x24f   : > { %v775_v19 = vadd.f32 %v774_v56, %v768_v40 }
 0x251   : > { %v776_v23 = vadd.f32 %v775_v19, %v769_v18 }
 0x253   : > { %v777_v27 = vadd.f32 %v776_v23, %v770_v21 }
 0x255   : > { %v778_v29 = vadd.f32 %v777_v27, %v771_v26  ;;  %v616_v34 = vpop.f32.mrf.mxu1 }
 0x257   : > { %v779_v30 = vadd.f32 %v778_v29, %v772_v28 }
 0x259   : > { %v780_v32 = vadd.f32 %v779_v30, %v773_v24 }
 0x25b   : > { %v787_v31 = vpack.c.bf16 %v780_v32, %v780_v32 }
 0x25d   : > { %956 = vmatmul.bf16.vlgmr.msrb.gmra.mxu0 %v787_v31  ;;  %969 = vmatmul.bf16.vlgmr.msrb.gmra.mxu1 %v787_v31  ;;  %1043 = vst [vmem:[%s1042_s18] sm:$0xf] %v787_v31 }
 0x25e   : > { %982 = vmatmul.bf16.vlgmr.msrb.gmra.mxu2 %v787_v31 }
 0x2d0   : > { %v640_v22 = vpop.f32.mrf.mxu3 }
 0x2d1   : > { %v641_v40 = vadd.f32 %v640_v22, %v386_v6 }
 0x2d8   : > { %v642_v50 = vpop.f32.mrf.mxu3 }
 0x2da   : > { %v957_v39 = vpop.f32.mrf.mxu0  ;;  %v970_v41 = vpop.f32.mrf.mxu1 }
 0x2db   : > { %v987_v43 = vadd.f32 %v957_v39, %v784_v36  ;;  %v988_v46 = vadd.f32 %v970_v41, %v785_v37 }
 0x2dd   : > { %v990_v47 = vadd.f32 %v987_v43, %v615_v42  ;;  %v1010_v49 = vadd.f32 %v988_v46, %v628_v38 }
 0x2df   : > { %v1405_v51 = vmul.f32 -1.442695, %v990_v47  ;;  %v1406_v53 = vmul.f32 -1.442695, %v1010_v49 }
 0x2e1   : > { %1594 = vpow2.f32 %v1405_v51  ;;  %v983_v54 = vpop.f32.mrf.mxu2 }
 0x2e2   : > { %1596 = vpow2.f32 %v1406_v53  ;;  %v959_v55 = vpop.f32.mrf.mxu0  ;;  %v972_v57 = vpop.f32.mrf.mxu1  ;;  %v989_v20 = vadd.f32 %v983_v54, %v786_v44 }
 0x2e7   : > { %v1595_v58 = vpop.eup %1594 }
 0x2e8   : > { %v1597_v60 = vpop.eup %1596  ;;  %v994_v61 = vadd.f32 1.0, %v1595_v58 }
 0x2e9   : > { %v1014_v62 = vadd.f32 1.0, %v1597_v60  ;;  %v985_v7 = vpop.f32.mrf.mxu2 }
 0x2ea   : > { %1598 = vrcp.f32 %v994_v61  ;;  %v1006_v13 = vand.u32 2147483648, %v994_v61  ;;  %v1004_v63 = vand.u32 2147483647, %v994_v61  ;;  %vm1000_vm1 = vweird.f32 %v994_v61 }
 0x2eb   : > { %1600 = vrcp.f32 %v1014_v62  ;;  %v1026_v11 = vand.u32 2147483648, %v1014_v62  ;;  %vm1020_vm5 = vweird.f32 %v1014_v62  ;;  %v1024_v23 = vand.u32 2147483647, %v1014_v62 }
 0x2ec   : > { %v1007_v59 = vor.u32 1.1754944e-38, %v1006_v13  ;;  %vm1005_vm3 = vcmp.eq.f32.partialorder %v1004_v63, 8.507059e+37 }
 0x2ed   : > { %v1027_v26 = vor.u32 1.1754944e-38, %v1026_v11  ;;  %vm1025_vm7 = vcmp.eq.f32.partialorder %v1024_v23, 8.507059e+37 }
 0x2f0   : > { %v1599_v8 = vpop.eup %1598 }
 0x2f1   : > { %v1601_v52 = vpop.eup %1600  ;;  %v996_v9 = vmul.f32 %v1599_v8, %v994_v61  ;;  %vm1001_vm0 = vweird.f32 %v1599_v8 }
 0x2f2   : > { %v1016_v10 = vmul.f32 %v1601_v52, %v1014_v62  ;;  %vm1002_vm2 = vmor %vm1000_vm1, %vm1001_vm0  ;;  %vm1021_vm4 = vweird.f32 %v1601_v52 }
 0x2f3   : > { %v997_v12 = vsub.f32 1.0, %v996_v9  ;;  %vm1022_vm6 = vmor %vm1020_vm5, %vm1021_vm4 }
 0x2f4   : > { %v1017_v48 = vsub.f32 1.0, %v1016_v10 }
 0x2f5   : > { %v998_v14 = vmul.f32 %v1599_v8, %v997_v12 }
 0x2f6   : > { %v1018_v15 = vmul.f32 %v1601_v52, %v1017_v48 }
 0x2f7   : > { %v999_v56 = vadd.f32 %v1599_v8, %v998_v14 }
 0x2f8   : > { %v1019_v19 = vadd.f32 %v1601_v52, %v1018_v15 }
 0x2f9   : > { %v1003_v16 = vsel %vm1002_vm2, %v1599_v8, %v999_v56 }
 0x2fa   : > { %v1008_v18 = vsel %vm1005_vm3, %v1007_v59, %v1003_v16  ;;  %v1023_v25 = vsel %vm1022_vm6, %v1601_v52, %v1019_v19 }
 0x2fb   : > { %v1030_v21 = vmul.f32 %v1008_v18, %v641_v40  ;;  %v1028_v27 = vsel %vm1025_vm7, %v1027_v26, %v1023_v25 }
 0x2fc   : > { %v1033_v28 = vsub.f32 1.0, %v1028_v27  ;;  %v1035_v30 = vmul.f32 %v1666_v2, %v1028_v27 }
 0x2fd   : > { %v1031_v17 = vadd.f32 %v1030_v21, %v989_v20 }
 0x2ff   : > { %1602 = vtanh.f32 %v1031_v17 }
 0x305   : > { %v1603_v29 = vpop.eup %1602 }
 0x306   : > { %v1034_v24 = vmul.f32 %v1603_v29, %v1033_v28 }
 0x308   : > { %v1036_v2 = vadd.f32 %v1035_v30, %v1034_v24   ;;  %396 = sbr.rel (!%p394_p0) target bundleno = 239 (0xef), region = 86 }
 0x30a   : > { %v1037_v32 = vpack.c.bf16 %v1036_v2, %v1036_v2 }
 0x30c   : > { %1040 = vst [vmem:[%s1039_s22] sm:$0xf] %v1037_v32 }
 0x30d   :  { %1052 = vsyncpa [#allocation4], 1 }
 0x30e   :  { %1053 = vsyncpa [#allocation6], 1 }

</bundles_post_ra>
